<compile_context>
chip_gen: v6e
topology: v6e:2x2x1
jax: 0.10.0
libtpu: 0.0.40
codegen_flags: <defaults>
</compile_context>

<pallas_src>
import jax
import jax.numpy as jnp
from jax.experimental import pallas as pl
from jax.experimental.pallas import tpu as pltpu


_LANE = 128
_SUBLANE = 8


def _round_up(x, m):
    return (x + m - 1) // m * m


def _chunk_and_pad(T, target=32):
    """Chunk length Tc and padded sequence length T_pad (multiple of Tc)."""
    if T <= target:
        return T, T
    return target, _round_up(T, target)


def _vmem_budget_bytes(n_layers, Tc, Bp, Dp, Hp, Op):
    buf = 2  # Pallas double-buffers pipelined operands
    b = buf * Tc * Bp * Dp * 2                          # x chunk (bf16)
    b += buf * Tc * Bp * Op * 4                         # fc-out chunk (f32)
    w_rows = Dp + (n_layers - 1) * Hp + n_layers * Hp   # all W_ih + W_hh rows
    b += buf * w_rows * Hp * 2                          # rnn weights (bf16)
    b += buf * Hp * Op * 2                              # fc_w (bf16)
    b += buf * (n_layers * 8 * Hp + 8 * Op) * 4         # biases (sublane-padded)
    b += buf * n_layers * Bp * Hp * 4                   # resident hidden carry
    b += Tc * Bp * Hp * (4 + 2)                         # pre / act scratches
    # Generous headroom, clamped so the request is valid on v7x (64 MiB/TC).
    return int(min(64 * 2**20, max(32 * 2**20, 2 * b)))


# ----------------------------------------------------------------------------
# Fused kernel: all layers + FC head, Tc time steps per grid step.
# ----------------------------------------------------------------------------
def _make_fused_kernel(n_layers, Tc, T_valid, T_pad):
    needs_mask = (T_pad != T_valid)

    def kernel(*refs):
        x_ref = refs[0]                                   # (Tc*Bp, Dp) bf16
        w_ih_refs = refs[1:1 + n_layers]                  # (D_in_p, Hp) bf16
        w_hh_refs = refs[1 + n_layers:1 + 2 * n_layers]   # (Hp, Hp) bf16
        b_refs = refs[1 + 2 * n_layers:1 + 3 * n_layers]  # (1, Hp) f32
        wfc_ref = refs[1 + 3 * n_layers]                  # (Hp, Op) bf16
        bfc_ref = refs[2 + 3 * n_layers]                  # (1, Op) f32
        out_ref = refs[3 + 3 * n_layers]                  # (Tc*Bp, Op) f32
        hidden_ref = refs[4 + 3 * n_layers]               # (L, Bp, Hp) f32 resident
        pre_ref = refs[5 + 3 * n_layers]                  # scratch (Tc*Bp, Hp) f32
        act_ref = refs[6 + 3 * n_layers]                  # scratch (Tc*Bp, Hp) bf16

        _, Bp, _ = hidden_ref.shape

        # h_0 = 0 (initHidden) -- hidden_ref is resident across the time grid.
        @pl.when(pl.program_id(0) == 0)
        def _():
            hidden_ref[...] = jnp.zeros_like(hidden_ref)

        t0 = pl.program_id(0) * Tc

        for l in range(n_layers):
            # Hoisted input projection: ONE big-M GEMM per layer per chunk,
            # bias folded in once (no per-step broadcasts).
            xin = x_ref[...] if l == 0 else act_ref[...]
            pre_ref[...] = (
                jnp.dot(xin, w_ih_refs[l][...],
                        preferred_element_type=jnp.float32)
                + b_refs[l][...])

            w_hh = w_hh_refs[l][...]                      # bf16, loaded once/chunk
            h = hidden_ref[l]                             # (Bp, Hp) f32 carry
            # Serial recurrence: only h @ W_hh + tanh on the critical path.
            for s in range(Tc):
                rows = pl.ds(s * Bp, Bp)
                h_new = jnp.tanh(
                    pre_ref[rows, :]
                    + jnp.dot(h.astype(jnp.bfloat16), w_hh,
                              preferred_element_type=jnp.float32))
                if needs_mask:
                    # Freeze the carry on padded time steps (tail of last chunk).
                    h = jnp.where(t0 + s < T_valid, h_new, h)
                else:
                    h = h_new
                act_ref[rows, :] = h.astype(jnp.bfloat16)
            hidden_ref[l] = h

        # Batched FC head: one (Tc*Bp, Hp) @ (Hp, Op) GEMM + one bias add,
        # one lane-dense store for the whole chunk.
        y = (jnp.dot(act_ref[...], wfc_ref[...],
                     preferred_element_type=jnp.float32)
             + bfc_ref[...])
        out_ref[...] = y.astype(out_ref.dtype)

    return kernel


# ----------------------------------------------------------------------------
# Parameter init (mirrors PyTorch U(-1/sqrt(H), 1/sqrt(H))) + kernel prep.
# ----------------------------------------------------------------------------
def init_params(key, input_size, hidden_size, output_size, n_layers):
    params = {"rnn": []}
    bound = 1.0 / float(hidden_size) ** 0.5
    for l in range(n_layers):
        d_in = input_size if l == 0 else hidden_size
        key, k1, k2, k3, k4 = jax.random.split(key, 5)
        params["rnn"].append({
            # stored already transposed: (D_in, H), (H, H)
            "w_ih": jax.random.uniform(k1, (d_in, hidden_size), jnp.float32,
                                       -bound, bound),
            "w_hh": jax.random.uniform(k2, (hidden_size, hidden_size),
                                       jnp.float32, -bound, bound),
            "b_ih": jax.random.uniform(k3, (1, hidden_size), jnp.float32,
                                       -bound, bound),
            "b_hh": jax.random.uniform(k4, (1, hidden_size), jnp.float32,
                                       -bound, bound),
        })
    key, k1, k2 = jax.random.split(key, 3)
    params["fc_w"] = jax.random.uniform(k1, (hidden_size, output_size),
                                        jnp.float32, -bound, bound)
    params["fc_b"] = jax.random.uniform(k2, (1, output_size), jnp.float32,
                                        -bound, bound)
    return params


def prepare_params(params, input_size, hidden_size, output_size):
    """Pad to lane-dense shapes, fuse the two biases, cast weights to bf16."""
    H = hidden_size
    Hp = _round_up(H, _LANE)
    Op = _round_up(output_size, _LANE)
    w_ih, w_hh, bias = [], [], []
    for lp in params["rnn"]:
        d_in = lp["w_ih"].shape[0]
        d_in_p = _round_up(d_in, _LANE)
        wi = jnp.zeros((d_in_p, Hp), jnp.float32).at[:d_in, :H].set(lp["w_ih"])
        wh = jnp.zeros((Hp, Hp), jnp.float32).at[:H, :H].set(lp["w_hh"])
        w_ih.append(wi.astype(jnp.bfloat16))
        w_hh.append(wh.astype(jnp.bfloat16))
        b = jnp.zeros((1, Hp), jnp.float32).at[:, :H].set(lp["b_ih"] + lp["b_hh"])
        bias.append(b)
    fc_w = (jnp.zeros((Hp, Op), jnp.float32)
            .at[:H, :output_size].set(params["fc_w"]).astype(jnp.bfloat16))
    fc_b = jnp.zeros((1, Op), jnp.float32).at[:, :output_size].set(params["fc_b"])
    return {"w_ih": w_ih, "w_hh": w_hh, "bias": bias, "fc_w": fc_w, "fc_b": fc_b}


# ----------------------------------------------------------------------------
# Full module forward (batch-first input, like the PyTorch module).
# ----------------------------------------------------------------------------
def make_rnn_forward(input_size, hidden_size, output_size, n_layers,
                     time_chunk=32):
    H, O = hidden_size, output_size
    Dp = _round_up(input_size, _LANE)
    Hp = _round_up(H, _LANE)
    Op = _round_up(O, _LANE)

    @jax.jit
    def forward(prepared, x_btd):
        B, T, D = x_btd.shape
        Bp = _round_up(B, _SUBLANE)
        Tc, T_pad = _chunk_and_pad(T, time_chunk)

        # -> time-major, zero-padded to (T_pad, Bp, Dp), flattened to a
        #    lane-dense 2-D slab (no in-kernel reshapes on the hot path).
        x = jnp.transpose(x_btd, (1, 0, 2)).astype(jnp.float32)
        x = jnp.pad(x, ((0, T_pad - T), (0, Bp - B), (0, Dp - D)))
        x = x.astype(jnp.bfloat16).reshape(T_pad * Bp, Dp)

        in_specs = [pl.BlockSpec((Tc * Bp, Dp), lambda t: (t, 0))]
        for l in range(n_layers):
            d_in_p = Dp if l == 0 else Hp
            in_specs.append(pl.BlockSpec((d_in_p, Hp), lambda t: (0, 0)))
        for _ in range(n_layers):
            in_specs.append(pl.BlockSpec((Hp, Hp), lambda t: (0, 0)))
        for _ in range(n_layers):
            in_specs.append(pl.BlockSpec((1, Hp), lambda t: (0, 0)))
        in_specs.append(pl.BlockSpec((Hp, Op), lambda t: (0, 0)))
        in_specs.append(pl.BlockSpec((1, Op), lambda t: (0, 0)))

        out_specs = [
            pl.BlockSpec((Tc * Bp, Op), lambda t: (t, 0)),          # fc(out)
            pl.BlockSpec((n_layers, Bp, Hp), lambda t: (0, 0, 0)),  # h carry
        ]
        out_shape = (jax.ShapeDtypeStruct((T_pad * Bp, Op), jnp.float32),
                     jax.ShapeDtypeStruct((n_layers, Bp, Hp), jnp.float32))

        out_pad, hidden_pad = pl.pallas_call(
            _make_fused_kernel(n_layers, Tc, T, T_pad),
            out_shape=out_shape,
            grid_spec=pltpu.PrefetchScalarGridSpec(
                num_scalar_prefetch=0,
                grid=(T_pad // Tc,),
                in_specs=in_specs,
                out_specs=out_specs,
                scratch_shapes=[
                    pltpu.VMEM((Tc * Bp, Hp), jnp.float32),   # hoisted pre-acts
                    pltpu.VMEM((Tc * Bp, Hp), jnp.bfloat16),  # layer outputs
                ]),
            compiler_params=pltpu.CompilerParams(
                dimension_semantics=("arbitrary",),
                vmem_limit_bytes=_vmem_budget_bytes(
                    n_layers, Tc, Bp, Dp, Hp, Op)),
        )(x, *prepared["w_ih"], *prepared["w_hh"], *prepared["bias"],
          prepared["fc_w"], prepared["fc_b"])

        # (T_pad*Bp, Op) -> (B, T, O) -> (B*T, O)  == fc(out.view(-1, H))
        out = out_pad.reshape(T_pad, Bp, Op)[:T, :B, :O]
        out = jnp.transpose(out, (1, 0, 2)).reshape(B * T, O)
        hidden = hidden_pad[:, :B, :H]                    # (n_layers, B, H)
        return out, hidden

    return forward


# ----------------------------------------------------------------------------
# Pure-JAX reference (same math as torch.nn.RNN(tanh) + nn.Linear, h_0 = 0)
# ----------------------------------------------------------------------------
def rnn_forward_ref(params, x_btd, hidden_size):
    B, T, _ = x_btd.shape
    n_layers = len(params["rnn"])
    hs = [jnp.zeros((B, hidden_size), jnp.float32) for _ in range(n_layers)]
    outs = []
    for t in range(T):
        a = x_btd[:, t, :]
        for l, lp in enumerate(params["rnn"]):
            hs[l] = jnp.tanh(a @ lp["w_ih"] + hs[l] @ lp["w_hh"]
                             + lp["b_ih"] + lp["b_hh"])
            a = hs[l]
        outs.append(a)
    out_bth = jnp.stack(outs, axis=1)                     # (B, T, H)
    out = out_bth.reshape(B * T, hidden_size) @ params["fc_w"] + params["fc_b"]
    hidden = jnp.stack(hs, axis=0)
    return out, hidden


if __name__ == "__main__":
    batch, seq = 2, 8
    input_size, hidden_size, output_size, n_layers = 16, 32, 10, 2

    key = jax.random.PRNGKey(0)
    pkey, xkey = jax.random.split(key)
    params = init_params(pkey, input_size, hidden_size, output_size, n_layers)
    prepared = prepare_params(params, input_size, hidden_size, output_size)
    x = jax.random.normal(xkey, (batch, seq, input_size), jnp.float32)

    forward = make_rnn_forward(input_size, hidden_size, output_size, n_layers)
    out, hidden = forward(prepared, x)
    jax.block_until_ready((out, hidden))

    assert out.shape == (batch * seq, output_size)
    assert hidden.shape == (n_layers, batch, hidden_size)

    ref_out, ref_hidden = rnn_forward_ref(params, x, hidden_size)
    # bf16 weights are intentional (perf review); tolerance reflects that.
    assert jnp.allclose(out, ref_out, atol=2e-2, rtol=2e-2)
    assert jnp.allclose(hidden, ref_hidden, atol=2e-2, rtol=2e-2)

    print("KERNEL_OK")
</pallas_src>

<mosaic_0001>
module attributes {stable_mosaic.version = 11 : i64} {
  func.func @kernel(%arg0: i32, %arg1: memref<64x128xbf16, #tpu.memory_space<vmem>>, %arg2: memref<128x128xbf16, #tpu.memory_space<vmem>>, %arg3: memref<128x128xbf16, #tpu.memory_space<vmem>>, %arg4: memref<128x128xbf16, #tpu.memory_space<vmem>>, %arg5: memref<128x128xbf16, #tpu.memory_space<vmem>>, %arg6: memref<1x128xf32, #tpu.memory_space<vmem>>, %arg7: memref<1x128xf32, #tpu.memory_space<vmem>>, %arg8: memref<128x128xbf16, #tpu.memory_space<vmem>>, %arg9: memref<1x128xf32, #tpu.memory_space<vmem>>, %arg10: memref<64x128xf32, #tpu.memory_space<vmem>>, %arg11: memref<2x8x128xf32, #tpu.memory_space<vmem>>, %arg12: memref<64x128xf32, #tpu.memory_space<vmem>>, %arg13: memref<64x128xbf16, #tpu.memory_space<vmem>>) attributes {dimension_semantics = [#tpu.dimension_semantics<arbitrary>], iteration_bounds = array<i64: 1>, scalar_prefetch = 0 : i64, scratch_operands = 2 : i64, tpu.core_type = #tpu.core_type<tc>, window_params = [{transform_indices = @transform_0, window_bounds = array<i64: 64, 128>}, {pipeline_mode = #tpu.pipeline_mode<synchronous>, transform_indices = @transform_1, window_bounds = array<i64: 128, 128>}, {pipeline_mode = #tpu.pipeline_mode<synchronous>, transform_indices = @transform_2, window_bounds = array<i64: 128, 128>}, {pipeline_mode = #tpu.pipeline_mode<synchronous>, transform_indices = @transform_3, window_bounds = array<i64: 128, 128>}, {pipeline_mode = #tpu.pipeline_mode<synchronous>, transform_indices = @transform_4, window_bounds = array<i64: 128, 128>}, {pipeline_mode = #tpu.pipeline_mode<synchronous>, transform_indices = @transform_5, window_bounds = array<i64: 1, 128>}, {pipeline_mode = #tpu.pipeline_mode<synchronous>, transform_indices = @transform_6, window_bounds = array<i64: 1, 128>}, {pipeline_mode = #tpu.pipeline_mode<synchronous>, transform_indices = @transform_7, window_bounds = array<i64: 128, 128>}, {pipeline_mode = #tpu.pipeline_mode<synchronous>, transform_indices = @transform_8, window_bounds = array<i64: 1, 128>}, {transform_indices = @transform_9, window_bounds = array<i64: 64, 128>}, {pipeline_mode = #tpu.pipeline_mode<synchronous>, transform_indices = @transform_10, window_bounds = array<i64: 2, 8, 128>}]} {
    %c0_i32 = arith.constant 0 : i32
    %0 = arith.cmpi eq, %arg0, %c0_i32 : i32
    %1 = arith.extui %0 : i1 to i32
    %c0_i32_0 = arith.constant 0 : i32
    %2 = arith.cmpi ne, %1, %c0_i32_0 : i32
    scf.if %2 {
      %cst_114 = arith.constant 0.000000e+00 : f32
      %148 = vector.broadcast %cst_114 : f32 to vector<2x8x128xf32>
      %c0_115 = arith.constant 0 : index
      %c0_116 = arith.constant 0 : index
      %c0_117 = arith.constant 0 : index
      %149 = vector.load %arg11[%c0_115, %c0_116, %c0_117] : memref<2x8x128xf32, #tpu.memory_space<vmem>>, vector<2x8x128xf32>
      tpu.vector_store %arg11[%c0_115, %c0_116, %c0_117], %148 {strides = array<i32>} : memref<2x8x128xf32, #tpu.memory_space<vmem>>, vector<2x8x128xf32>,
    } else {
    }
    %c0 = arith.constant 0 : index
    %c0_1 = arith.constant 0 : index
    %3 = vector.load %arg1[%c0, %c0_1] : memref<64x128xbf16, #tpu.memory_space<vmem>>, vector<64x128xbf16>
    %c0_2 = arith.constant 0 : index
    %c0_3 = arith.constant 0 : index
    %4 = vector.load %arg2[%c0_2, %c0_3] : memref<128x128xbf16, #tpu.memory_space<vmem>>, vector<128x128xbf16>
    %cst = arith.constant dense<0.000000e+00> : vector<64x128xf32>
    %5 = tpu.matmul %3, %4, %cst {dimension_numbers = #tpu.dot_dimension_numbers<[1], [0], [0], [1], [0, 0, 1, 1], [], []>} : vector<64x128xbf16>, vector<128x128xbf16>, vector<64x128xf32> -> vector<64x128xf32>
    %c0_4 = arith.constant 0 : index
    %c0_5 = arith.constant 0 : index
    %6 = vector.load %arg6[%c0_4, %c0_5] : memref<1x128xf32, #tpu.memory_space<vmem>>, vector<1x128xf32>
    %7 = vector.broadcast %6 : vector<1x128xf32> to vector<64x128xf32>
    %8 = arith.addf %5, %7 : vector<64x128xf32>
    %c0_6 = arith.constant 0 : index
    %c0_7 = arith.constant 0 : index
    %9 = vector.load %arg12[%c0_6, %c0_7] : memref<64x128xf32, #tpu.memory_space<vmem>>, vector<64x128xf32>
    tpu.vector_store %arg12[%c0_6, %c0_7], %8 {strides = array<i32>} : memref<64x128xf32, #tpu.memory_space<vmem>>, vector<64x128xf32>,
    %c0_8 = arith.constant 0 : index
    %c0_9 = arith.constant 0 : index
    %10 = vector.load %arg4[%c0_8, %c0_9] : memref<128x128xbf16, #tpu.memory_space<vmem>>, vector<128x128xbf16>
    %c0_10 = arith.constant 0 : index
    %c0_11 = arith.constant 0 : index
    %c0_12 = arith.constant 0 : index
    %11 = vector.load %arg11[%c0_10, %c0_11, %c0_12] : memref<2x8x128xf32, #tpu.memory_space<vmem>>, vector<1x8x128xf32>
    %12 = vector.shape_cast %11 : vector<1x8x128xf32> to vector<8x128xf32>
    %c0_13 = arith.constant 0 : index
    %c0_14 = arith.constant 0 : index
    %13 = vector.load %arg12[%c0_13, %c0_14] : memref<64x128xf32, #tpu.memory_space<vmem>>, vector<8x128xf32>
    %14 = arith.truncf %12 : vector<8x128xf32> to vector<8x128xbf16>
    %cst_15 = arith.constant dense<0.000000e+00> : vector<8x128xf32>
    %15 = tpu.matmul %14, %10, %cst_15 {dimension_numbers = #tpu.dot_dimension_numbers<[1], [0], [0], [1], [0, 0, 1, 1], [], []>} : vector<8x128xbf16>, vector<128x128xbf16>, vector<8x128xf32> -> vector<8x128xf32>
    %16 = arith.addf %13, %15 : vector<8x128xf32>
    %17 = math.tanh %16 : vector<8x128xf32>
    %18 = arith.truncf %17 : vector<8x128xf32> to vector<8x128xbf16>
    %c0_16 = arith.constant 0 : index
    %c0_17 = arith.constant 0 : index
    %19 = vector.load %arg13[%c0_16, %c0_17] : memref<64x128xbf16, #tpu.memory_space<vmem>>, vector<8x128xbf16>
    tpu.vector_store %arg13[%c0_16, %c0_17], %18 {strides = array<i32>} : memref<64x128xbf16, #tpu.memory_space<vmem>>, vector<8x128xbf16>,
    %c8 = arith.constant 8 : index
    %c0_18 = arith.constant 0 : index
    %20 = vector.load %arg12[%c8, %c0_18] : memref<64x128xf32, #tpu.memory_space<vmem>>, vector<8x128xf32>
    %21 = arith.truncf %17 : vector<8x128xf32> to vector<8x128xbf16>
    %cst_19 = arith.constant dense<0.000000e+00> : vector<8x128xf32>
    %22 = tpu.matmul %21, %10, %cst_19 {dimension_numbers = #tpu.dot_dimension_numbers<[1], [0], [0], [1], [0, 0, 1, 1], [], []>} : vector<8x128xbf16>, vector<128x128xbf16>, vector<8x128xf32> -> vector<8x128xf32>
    %23 = arith.addf %20, %22 : vector<8x128xf32>
    %24 = math.tanh %23 : vector<8x128xf32>
    %25 = arith.truncf %24 : vector<8x128xf32> to vector<8x128xbf16>
    %c8_20 = arith.constant 8 : index
    %c0_21 = arith.constant 0 : index
    %26 = vector.load %arg13[%c8_20, %c0_21] : memref<64x128xbf16, #tpu.memory_space<vmem>>, vector<8x128xbf16>
    tpu.vector_store %arg13[%c8_20, %c0_21], %25 {strides = array<i32>} : memref<64x128xbf16, #tpu.memory_space<vmem>>, vector<8x128xbf16>,
    %c16 = arith.constant 16 : index
    %c0_22 = arith.constant 0 : index
    %27 = vector.load %arg12[%c16, %c0_22] : memref<64x128xf32, #tpu.memory_space<vmem>>, vector<8x128xf32>
    %28 = arith.truncf %24 : vector<8x128xf32> to vector<8x128xbf16>
    %cst_23 = arith.constant dense<0.000000e+00> : vector<8x128xf32>
    %29 = tpu.matmul %28, %10, %cst_23 {dimension_numbers = #tpu.dot_dimension_numbers<[1], [0], [0], [1], [0, 0, 1, 1], [], []>} : vector<8x128xbf16>, vector<128x128xbf16>, vector<8x128xf32> -> vector<8x128xf32>
    %30 = arith.addf %27, %29 : vector<8x128xf32>
    %31 = math.tanh %30 : vector<8x128xf32>
    %32 = arith.truncf %31 : vector<8x128xf32> to vector<8x128xbf16>
    %c16_24 = arith.constant 16 : index
    %c0_25 = arith.constant 0 : index
    %33 = vector.load %arg13[%c16_24, %c0_25] : memref<64x128xbf16, #tpu.memory_space<vmem>>, vector<8x128xbf16>
    tpu.vector_store %arg13[%c16_24, %c0_25], %32 {strides = array<i32>} : memref<64x128xbf16, #tpu.memory_space<vmem>>, vector<8x128xbf16>,
    %c24 = arith.constant 24 : index
    %c0_26 = arith.constant 0 : index
    %34 = vector.load %arg12[%c24, %c0_26] : memref<64x128xf32, #tpu.memory_space<vmem>>, vector<8x128xf32>
    %35 = arith.truncf %31 : vector<8x128xf32> to vector<8x128xbf16>
    %cst_27 = arith.constant dense<0.000000e+00> : vector<8x128xf32>
    %36 = tpu.matmul %35, %10, %cst_27 {dimension_numbers = #tpu.dot_dimension_numbers<[1], [0], [0], [1], [0, 0, 1, 1], [], []>} : vector<8x128xbf16>, vector<128x128xbf16>, vector<8x128xf32> -> vector<8x128xf32>
    %37 = arith.addf %34, %36 : vector<8x128xf32>
    %38 = math.tanh %37 : vector<8x128xf32>
    %39 = arith.truncf %38 : vector<8x128xf32> to vector<8x128xbf16>
    %c24_28 = arith.constant 24 : index
    %c0_29 = arith.constant 0 : index
    %40 = vector.load %arg13[%c24_28, %c0_29] : memref<64x128xbf16, #tpu.memory_space<vmem>>, vector<8x128xbf16>
    tpu.vector_store %arg13[%c24_28, %c0_29], %39 {strides = array<i32>} : memref<64x128xbf16, #tpu.memory_space<vmem>>, vector<8x128xbf16>,
    %c32 = arith.constant 32 : index
    %c0_30 = arith.constant 0 : index
    %41 = vector.load %arg12[%c32, %c0_30] : memref<64x128xf32, #tpu.memory_space<vmem>>, vector<8x128xf32>
    %42 = arith.truncf %38 : vector<8x128xf32> to vector<8x128xbf16>
    %cst_31 = arith.constant dense<0.000000e+00> : vector<8x128xf32>
    %43 = tpu.matmul %42, %10, %cst_31 {dimension_numbers = #tpu.dot_dimension_numbers<[1], [0], [0], [1], [0, 0, 1, 1], [], []>} : vector<8x128xbf16>, vector<128x128xbf16>, vector<8x128xf32> -> vector<8x128xf32>
    %44 = arith.addf %41, %43 : vector<8x128xf32>
    %45 = math.tanh %44 : vector<8x128xf32>
    %46 = arith.truncf %45 : vector<8x128xf32> to vector<8x128xbf16>
    %c32_32 = arith.constant 32 : index
    %c0_33 = arith.constant 0 : index
    %47 = vector.load %arg13[%c32_32, %c0_33] : memref<64x128xbf16, #tpu.memory_space<vmem>>, vector<8x128xbf16>
    tpu.vector_store %arg13[%c32_32, %c0_33], %46 {strides = array<i32>} : memref<64x128xbf16, #tpu.memory_space<vmem>>, vector<8x128xbf16>,
    %c40 = arith.constant 40 : index
    %c0_34 = arith.constant 0 : index
    %48 = vector.load %arg12[%c40, %c0_34] : memref<64x128xf32, #tpu.memory_space<vmem>>, vector<8x128xf32>
    %49 = arith.truncf %45 : vector<8x128xf32> to vector<8x128xbf16>
    %cst_35 = arith.constant dense<0.000000e+00> : vector<8x128xf32>
    %50 = tpu.matmul %49, %10, %cst_35 {dimension_numbers = #tpu.dot_dimension_numbers<[1], [0], [0], [1], [0, 0, 1, 1], [], []>} : vector<8x128xbf16>, vector<128x128xbf16>, vector<8x128xf32> -> vector<8x128xf32>
    %51 = arith.addf %48, %50 : vector<8x128xf32>
    %52 = math.tanh %51 : vector<8x128xf32>
    %53 = arith.truncf %52 : vector<8x128xf32> to vector<8x128xbf16>
    %c40_36 = arith.constant 40 : index
    %c0_37 = arith.constant 0 : index
    %54 = vector.load %arg13[%c40_36, %c0_37] : memref<64x128xbf16, #tpu.memory_space<vmem>>, vector<8x128xbf16>
    tpu.vector_store %arg13[%c40_36, %c0_37], %53 {strides = array<i32>} : memref<64x128xbf16, #tpu.memory_space<vmem>>, vector<8x128xbf16>,
    %c48 = arith.constant 48 : index
    %c0_38 = arith.constant 0 : index
    %55 = vector.load %arg12[%c48, %c0_38] : memref<64x128xf32, #tpu.memory_space<vmem>>, vector<8x128xf32>
    %56 = arith.truncf %52 : vector<8x128xf32> to vector<8x128xbf16>
    %cst_39 = arith.constant dense<0.000000e+00> : vector<8x128xf32>
    %57 = tpu.matmul %56, %10, %cst_39 {dimension_numbers = #tpu.dot_dimension_numbers<[1], [0], [0], [1], [0, 0, 1, 1], [], []>} : vector<8x128xbf16>, vector<128x128xbf16>, vector<8x128xf32> -> vector<8x128xf32>
    %58 = arith.addf %55, %57 : vector<8x128xf32>
    %59 = math.tanh %58 : vector<8x128xf32>
    %60 = arith.truncf %59 : vector<8x128xf32> to vector<8x128xbf16>
    %c48_40 = arith.constant 48 : index
    %c0_41 = arith.constant 0 : index
    %61 = vector.load %arg13[%c48_40, %c0_41] : memref<64x128xbf16, #tpu.memory_space<vmem>>, vector<8x128xbf16>
    tpu.vector_store %arg13[%c48_40, %c0_41], %60 {strides = array<i32>} : memref<64x128xbf16, #tpu.memory_space<vmem>>, vector<8x128xbf16>,
    %c56 = arith.constant 56 : index
    %c0_42 = arith.constant 0 : index
    %62 = vector.load %arg12[%c56, %c0_42] : memref<64x128xf32, #tpu.memory_space<vmem>>, vector<8x128xf32>
    %63 = arith.truncf %59 : vector<8x128xf32> to vector<8x128xbf16>
    %cst_43 = arith.constant dense<0.000000e+00> : vector<8x128xf32>
    %64 = tpu.matmul %63, %10, %cst_43 {dimension_numbers = #tpu.dot_dimension_numbers<[1], [0], [0], [1], [0, 0, 1, 1], [], []>} : vector<8x128xbf16>, vector<128x128xbf16>, vector<8x128xf32> -> vector<8x128xf32>
    %65 = arith.addf %62, %64 : vector<8x128xf32>
    %66 = math.tanh %65 : vector<8x128xf32>
    %67 = arith.truncf %66 : vector<8x128xf32> to vector<8x128xbf16>
    %c56_44 = arith.constant 56 : index
    %c0_45 = arith.constant 0 : index
    %68 = vector.load %arg13[%c56_44, %c0_45] : memref<64x128xbf16, #tpu.memory_space<vmem>>, vector<8x128xbf16>
    tpu.vector_store %arg13[%c56_44, %c0_45], %67 {strides = array<i32>} : memref<64x128xbf16, #tpu.memory_space<vmem>>, vector<8x128xbf16>,
    %c0_46 = arith.constant 0 : index
    %c0_47 = arith.constant 0 : index
    %c0_48 = arith.constant 0 : index
    %69 = vector.load %arg11[%c0_46, %c0_47, %c0_48] : memref<2x8x128xf32, #tpu.memory_space<vmem>>, vector<1x8x128xf32>
    %70 = vector.shape_cast %69 : vector<1x8x128xf32> to vector<8x128xf32>
    %71 = vector.shape_cast %66 : vector<8x128xf32> to vector<1x8x128xf32>
    tpu.vector_store %arg11[%c0_46, %c0_47, %c0_48], %71 {strides = array<i32>} : memref<2x8x128xf32, #tpu.memory_space<vmem>>, vector<1x8x128xf32>,
    %c0_49 = arith.constant 0 : index
    %c0_50 = arith.constant 0 : index
    %72 = vector.load %arg13[%c0_49, %c0_50] : memref<64x128xbf16, #tpu.memory_space<vmem>>, vector<64x128xbf16>
    %c0_51 = arith.constant 0 : index
    %c0_52 = arith.constant 0 : index
    %73 = vector.load %arg3[%c0_51, %c0_52] : memref<128x128xbf16, #tpu.memory_space<vmem>>, vector<128x128xbf16>
    %cst_53 = arith.constant dense<0.000000e+00> : vector<64x128xf32>
    %74 = tpu.matmul %72, %73, %cst_53 {dimension_numbers = #tpu.dot_dimension_numbers<[1], [0], [0], [1], [0, 0, 1, 1], [], []>} : vector<64x128xbf16>, vector<128x128xbf16>, vector<64x128xf32> -> vector<64x128xf32>
    %c0_54 = arith.constant 0 : index
    %c0_55 = arith.constant 0 : index
    %75 = vector.load %arg7[%c0_54, %c0_55] : memref<1x128xf32, #tpu.memory_space<vmem>>, vector<1x128xf32>
    %76 = vector.broadcast %75 : vector<1x128xf32> to vector<64x128xf32>
    %77 = arith.addf %74, %76 : vector<64x128xf32>
    %c0_56 = arith.constant 0 : index
    %c0_57 = arith.constant 0 : index
    %78 = vector.load %arg12[%c0_56, %c0_57] : memref<64x128xf32, #tpu.memory_space<vmem>>, vector<64x128xf32>
    tpu.vector_store %arg12[%c0_56, %c0_57], %77 {strides = array<i32>} : memref<64x128xf32, #tpu.memory_space<vmem>>, vector<64x128xf32>,
    %c0_58 = arith.constant 0 : index
    %c0_59 = arith.constant 0 : index
    %79 = vector.load %arg5[%c0_58, %c0_59] : memref<128x128xbf16, #tpu.memory_space<vmem>>, vector<128x128xbf16>
    %c1 = arith.constant 1 : index
    %c0_60 = arith.constant 0 : index
    %c0_61 = arith.constant 0 : index
    %80 = vector.load %arg11[%c1, %c0_60, %c0_61] : memref<2x8x128xf32, #tpu.memory_space<vmem>>, vector<1x8x128xf32>
    %81 = vector.shape_cast %80 : vector<1x8x128xf32> to vector<8x128xf32>
    %c0_62 = arith.constant 0 : index
    %c0_63 = arith.constant 0 : index
    %82 = vector.load %arg12[%c0_62, %c0_63] : memref<64x128xf32, #tpu.memory_space<vmem>>, vector<8x128xf32>
    %83 = arith.truncf %81 : vector<8x128xf32> to vector<8x128xbf16>
    %cst_64 = arith.constant dense<0.000000e+00> : vector<8x128xf32>
    %84 = tpu.matmul %83, %79, %cst_64 {dimension_numbers = #tpu.dot_dimension_numbers<[1], [0], [0], [1], [0, 0, 1, 1], [], []>} : vector<8x128xbf16>, vector<128x128xbf16>, vector<8x128xf32> -> vector<8x128xf32>
    %85 = arith.addf %82, %84 : vector<8x128xf32>
    %86 = math.tanh %85 : vector<8x128xf32>
    %87 = arith.truncf %86 : vector<8x128xf32> to vector<8x128xbf16>
    %c0_65 = arith.constant 0 : index
    %c0_66 = arith.constant 0 : index
    %88 = vector.load %arg13[%c0_65, %c0_66] : memref<64x128xbf16, #tpu.memory_space<vmem>>, vector<8x128xbf16>
    tpu.vector_store %arg13[%c0_65, %c0_66], %87 {strides = array<i32>} : memref<64x128xbf16, #tpu.memory_space<vmem>>, vector<8x128xbf16>,
    %c8_67 = arith.constant 8 : index
    %c0_68 = arith.constant 0 : index
    %89 = vector.load %arg12[%c8_67, %c0_68] : memref<64x128xf32, #tpu.memory_space<vmem>>, vector<8x128xf32>
    %90 = arith.truncf %86 : vector<8x128xf32> to vector<8x128xbf16>
    %cst_69 = arith.constant dense<0.000000e+00> : vector<8x128xf32>
    %91 = tpu.matmul %90, %79, %cst_69 {dimension_numbers = #tpu.dot_dimension_numbers<[1], [0], [0], [1], [0, 0, 1, 1], [], []>} : vector<8x128xbf16>, vector<128x128xbf16>, vector<8x128xf32> -> vector<8x128xf32>
    %92 = arith.addf %89, %91 : vector<8x128xf32>
    %93 = math.tanh %92 : vector<8x128xf32>
    %94 = arith.truncf %93 : vector<8x128xf32> to vector<8x128xbf16>
    %c8_70 = arith.constant 8 : index
    %c0_71 = arith.constant 0 : index
    %95 = vector.load %arg13[%c8_70, %c0_71] : memref<64x128xbf16, #tpu.memory_space<vmem>>, vector<8x128xbf16>
    tpu.vector_store %arg13[%c8_70, %c0_71], %94 {strides = array<i32>} : memref<64x128xbf16, #tpu.memory_space<vmem>>, vector<8x128xbf16>,
    %c16_72 = arith.constant 16 : index
    %c0_73 = arith.constant 0 : index
    %96 = vector.load %arg12[%c16_72, %c0_73] : memref<64x128xf32, #tpu.memory_space<vmem>>, vector<8x128xf32>
    %97 = arith.truncf %93 : vector<8x128xf32> to vector<8x128xbf16>
    %cst_74 = arith.constant dense<0.000000e+00> : vector<8x128xf32>
    %98 = tpu.matmul %97, %79, %cst_74 {dimension_numbers = #tpu.dot_dimension_numbers<[1], [0], [0], [1], [0, 0, 1, 1], [], []>} : vector<8x128xbf16>, vector<128x128xbf16>, vector<8x128xf32> -> vector<8x128xf32>
    %99 = arith.addf %96, %98 : vector<8x128xf32>
    %100 = math.tanh %99 : vector<8x128xf32>
    %101 = arith.truncf %100 : vector<8x128xf32> to vector<8x128xbf16>
    %c16_75 = arith.constant 16 : index
    %c0_76 = arith.constant 0 : index
    %102 = vector.load %arg13[%c16_75, %c0_76] : memref<64x128xbf16, #tpu.memory_space<vmem>>, vector<8x128xbf16>
    tpu.vector_store %arg13[%c16_75, %c0_76], %101 {strides = array<i32>} : memref<64x128xbf16, #tpu.memory_space<vmem>>, vector<8x128xbf16>,
    %c24_77 = arith.constant 24 : index
    %c0_78 = arith.constant 0 : index
    %103 = vector.load %arg12[%c24_77, %c0_78] : memref<64x128xf32, #tpu.memory_space<vmem>>, vector<8x128xf32>
    %104 = arith.truncf %100 : vector<8x128xf32> to vector<8x128xbf16>
    %cst_79 = arith.constant dense<0.000000e+00> : vector<8x128xf32>
    %105 = tpu.matmul %104, %79, %cst_79 {dimension_numbers = #tpu.dot_dimension_numbers<[1], [0], [0], [1], [0, 0, 1, 1], [], []>} : vector<8x128xbf16>, vector<128x128xbf16>, vector<8x128xf32> -> vector<8x128xf32>
    %106 = arith.addf %103, %105 : vector<8x128xf32>
    %107 = math.tanh %106 : vector<8x128xf32>
    %108 = arith.truncf %107 : vector<8x128xf32> to vector<8x128xbf16>
    %c24_80 = arith.constant 24 : index
    %c0_81 = arith.constant 0 : index
    %109 = vector.load %arg13[%c24_80, %c0_81] : memref<64x128xbf16, #tpu.memory_space<vmem>>, vector<8x128xbf16>
    tpu.vector_store %arg13[%c24_80, %c0_81], %108 {strides = array<i32>} : memref<64x128xbf16, #tpu.memory_space<vmem>>, vector<8x128xbf16>,
    %c32_82 = arith.constant 32 : index
    %c0_83 = arith.constant 0 : index
    %110 = vector.load %arg12[%c32_82, %c0_83] : memref<64x128xf32, #tpu.memory_space<vmem>>, vector<8x128xf32>
    %111 = arith.truncf %107 : vector<8x128xf32> to vector<8x128xbf16>
    %cst_84 = arith.constant dense<0.000000e+00> : vector<8x128xf32>
    %112 = tpu.matmul %111, %79, %cst_84 {dimension_numbers = #tpu.dot_dimension_numbers<[1], [0], [0], [1], [0, 0, 1, 1], [], []>} : vector<8x128xbf16>, vector<128x128xbf16>, vector<8x128xf32> -> vector<8x128xf32>
    %113 = arith.addf %110, %112 : vector<8x128xf32>
    %114 = math.tanh %113 : vector<8x128xf32>
    %115 = arith.truncf %114 : vector<8x128xf32> to vector<8x128xbf16>
    %c32_85 = arith.constant 32 : index
    %c0_86 = arith.constant 0 : index
    %116 = vector.load %arg13[%c32_85, %c0_86] : memref<64x128xbf16, #tpu.memory_space<vmem>>, vector<8x128xbf16>
    tpu.vector_store %arg13[%c32_85, %c0_86], %115 {strides = array<i32>} : memref<64x128xbf16, #tpu.memory_space<vmem>>, vector<8x128xbf16>,
    %c40_87 = arith.constant 40 : index
    %c0_88 = arith.constant 0 : index
    %117 = vector.load %arg12[%c40_87, %c0_88] : memref<64x128xf32, #tpu.memory_space<vmem>>, vector<8x128xf32>
    %118 = arith.truncf %114 : vector<8x128xf32> to vector<8x128xbf16>
    %cst_89 = arith.constant dense<0.000000e+00> : vector<8x128xf32>
    %119 = tpu.matmul %118, %79, %cst_89 {dimension_numbers = #tpu.dot_dimension_numbers<[1], [0], [0], [1], [0, 0, 1, 1], [], []>} : vector<8x128xbf16>, vector<128x128xbf16>, vector<8x128xf32> -> vector<8x128xf32>
    %120 = arith.addf %117, %119 : vector<8x128xf32>
    %121 = math.tanh %120 : vector<8x128xf32>
    %122 = arith.truncf %121 : vector<8x128xf32> to vector<8x128xbf16>
    %c40_90 = arith.constant 40 : index
    %c0_91 = arith.constant 0 : index
    %123 = vector.load %arg13[%c40_90, %c0_91] : memref<64x128xbf16, #tpu.memory_space<vmem>>, vector<8x128xbf16>
    tpu.vector_store %arg13[%c40_90, %c0_91], %122 {strides = array<i32>} : memref<64x128xbf16, #tpu.memory_space<vmem>>, vector<8x128xbf16>,
    %c48_92 = arith.constant 48 : index
    %c0_93 = arith.constant 0 : index
    %124 = vector.load %arg12[%c48_92, %c0_93] : memref<64x128xf32, #tpu.memory_space<vmem>>, vector<8x128xf32>
    %125 = arith.truncf %121 : vector<8x128xf32> to vector<8x128xbf16>
    %cst_94 = arith.constant dense<0.000000e+00> : vector<8x128xf32>
    %126 = tpu.matmul %125, %79, %cst_94 {dimension_numbers = #tpu.dot_dimension_numbers<[1], [0], [0], [1], [0, 0, 1, 1], [], []>} : vector<8x128xbf16>, vector<128x128xbf16>, vector<8x128xf32> -> vector<8x128xf32>
    %127 = arith.addf %124, %126 : vector<8x128xf32>
    %128 = math.tanh %127 : vector<8x128xf32>
    %129 = arith.truncf %128 : vector<8x128xf32> to vector<8x128xbf16>
    %c48_95 = arith.constant 48 : index
    %c0_96 = arith.constant 0 : index
    %130 = vector.load %arg13[%c48_95, %c0_96] : memref<64x128xbf16, #tpu.memory_space<vmem>>, vector<8x128xbf16>
    tpu.vector_store %arg13[%c48_95, %c0_96], %129 {strides = array<i32>} : memref<64x128xbf16, #tpu.memory_space<vmem>>, vector<8x128xbf16>,
    %c56_97 = arith.constant 56 : index
    %c0_98 = arith.constant 0 : index
    %131 = vector.load %arg12[%c56_97, %c0_98] : memref<64x128xf32, #tpu.memory_space<vmem>>, vector<8x128xf32>
    %132 = arith.truncf %128 : vector<8x128xf32> to vector<8x128xbf16>
    %cst_99 = arith.constant dense<0.000000e+00> : vector<8x128xf32>
    %133 = tpu.matmul %132, %79, %cst_99 {dimension_numbers = #tpu.dot_dimension_numbers<[1], [0], [0], [1], [0, 0, 1, 1], [], []>} : vector<8x128xbf16>, vector<128x128xbf16>, vector<8x128xf32> -> vector<8x128xf32>
    %134 = arith.addf %131, %133 : vector<8x128xf32>
    %135 = math.tanh %134 : vector<8x128xf32>
    %136 = arith.truncf %135 : vector<8x128xf32> to vector<8x128xbf16>
    %c56_100 = arith.constant 56 : index
    %c0_101 = arith.constant 0 : index
    %137 = vector.load %arg13[%c56_100, %c0_101] : memref<64x128xbf16, #tpu.memory_space<vmem>>, vector<8x128xbf16>
    tpu.vector_store %arg13[%c56_100, %c0_101], %136 {strides = array<i32>} : memref<64x128xbf16, #tpu.memory_space<vmem>>, vector<8x128xbf16>,
    %c1_102 = arith.constant 1 : index
    %c0_103 = arith.constant 0 : index
    %c0_104 = arith.constant 0 : index
    %138 = vector.load %arg11[%c1_102, %c0_103, %c0_104] : memref<2x8x128xf32, #tpu.memory_space<vmem>>, vector<1x8x128xf32>
    %139 = vector.shape_cast %138 : vector<1x8x128xf32> to vector<8x128xf32>
    %140 = vector.shape_cast %135 : vector<8x128xf32> to vector<1x8x128xf32>
    tpu.vector_store %arg11[%c1_102, %c0_103, %c0_104], %140 {strides = array<i32>} : memref<2x8x128xf32, #tpu.memory_space<vmem>>, vector<1x8x128xf32>,
    %c0_105 = arith.constant 0 : index
    %c0_106 = arith.constant 0 : index
    %141 = vector.load %arg13[%c0_105, %c0_106] : memref<64x128xbf16, #tpu.memory_space<vmem>>, vector<64x128xbf16>
    %c0_107 = arith.constant 0 : index
    %c0_108 = arith.constant 0 : index
    %142 = vector.load %arg8[%c0_107, %c0_108] : memref<128x128xbf16, #tpu.memory_space<vmem>>, vector<128x128xbf16>
    %cst_109 = arith.constant dense<0.000000e+00> : vector<64x128xf32>
    %143 = tpu.matmul %141, %142, %cst_109 {dimension_numbers = #tpu.dot_dimension_numbers<[1], [0], [0], [1], [0, 0, 1, 1], [], []>} : vector<64x128xbf16>, vector<128x128xbf16>, vector<64x128xf32> -> vector<64x128xf32>
    %c0_110 = arith.constant 0 : index
    %c0_111 = arith.constant 0 : index
    %144 = vector.load %arg9[%c0_110, %c0_111] : memref<1x128xf32, #tpu.memory_space<vmem>>, vector<1x128xf32>
    %145 = vector.broadcast %144 : vector<1x128xf32> to vector<64x128xf32>
    %146 = arith.addf %143, %145 : vector<64x128xf32>
    %c0_112 = arith.constant 0 : index
    %c0_113 = arith.constant 0 : index
    %147 = vector.load %arg10[%c0_112, %c0_113] : memref<64x128xf32, #tpu.memory_space<vmem>>, vector<64x128xf32>
    tpu.vector_store %arg10[%c0_112, %c0_113], %146 {strides = array<i32>} : memref<64x128xf32, #tpu.memory_space<vmem>>, vector<64x128xf32>,
    return
  }
  func.func @transform_0(%arg0: i32) -> (i32, i32) {
    %c0_i32 = arith.constant 0 : i32
    %c0_i32_0 = arith.constant 0 : i32
    return %arg0, %c0_i32 : i32, i32
  }
  func.func @transform_1(%arg0: i32) -> (i32, i32) {
    %c0_i32 = arith.constant 0 : i32
    %c0_i32_0 = arith.constant 0 : i32
    %c0_i32_1 = arith.constant 0 : i32
    return %c0_i32, %c0_i32_0 : i32, i32
  }
  func.func @transform_2(%arg0: i32) -> (i32, i32) {
    %c0_i32 = arith.constant 0 : i32
    %c0_i32_0 = arith.constant 0 : i32
    %c0_i32_1 = arith.constant 0 : i32
    return %c0_i32, %c0_i32_0 : i32, i32
  }
  func.func @transform_3(%arg0: i32) -> (i32, i32) {
    %c0_i32 = arith.constant 0 : i32
    %c0_i32_0 = arith.constant 0 : i32
    %c0_i32_1 = arith.constant 0 : i32
    return %c0_i32, %c0_i32_0 : i32, i32
  }
  func.func @transform_4(%arg0: i32) -> (i32, i32) {
    %c0_i32 = arith.constant 0 : i32
    %c0_i32_0 = arith.constant 0 : i32
    %c0_i32_1 = arith.constant 0 : i32
    return %c0_i32, %c0_i32_0 : i32, i32
  }
  func.func @transform_5(%arg0: i32) -> (i32, i32) {
    %c0_i32 = arith.constant 0 : i32
    %c0_i32_0 = arith.constant 0 : i32
    %c0_i32_1 = arith.constant 0 : i32
    return %c0_i32, %c0_i32_0 : i32, i32
  }
  func.func @transform_6(%arg0: i32) -> (i32, i32) {
    %c0_i32 = arith.constant 0 : i32
    %c0_i32_0 = arith.constant 0 : i32
    %c0_i32_1 = arith.constant 0 : i32
    return %c0_i32, %c0_i32_0 : i32, i32
  }
  func.func @transform_7(%arg0: i32) -> (i32, i32) {
    %c0_i32 = arith.constant 0 : i32
    %c0_i32_0 = arith.constant 0 : i32
    %c0_i32_1 = arith.constant 0 : i32
    return %c0_i32, %c0_i32_0 : i32, i32
  }
  func.func @transform_8(%arg0: i32) -> (i32, i32) {
    %c0_i32 = arith.constant 0 : i32
    %c0_i32_0 = arith.constant 0 : i32
    %c0_i32_1 = arith.constant 0 : i32
    return %c0_i32, %c0_i32_0 : i32, i32
  }
  func.func @transform_9(%arg0: i32) -> (i32, i32) {
    %c0_i32 = arith.constant 0 : i32
    %c0_i32_0 = arith.constant 0 : i32
    return %arg0, %c0_i32 : i32, i32
  }
  func.func @transform_10(%arg0: i32) -> (i32, i32, i32) {
    %c0_i32 = arith.constant 0 : i32
    %c0_i32_0 = arith.constant 0 : i32
    %c0_i32_1 = arith.constant 0 : i32
    %c0_i32_2 = arith.constant 0 : i32
    return %c0_i32, %c0_i32_0, %c0_i32_1 : i32, i32, i32
  }
}

</mosaic_0001>

<bundles_post_ra>
// kernel: forward.1
= control target key start
LH: loop header
LB: loop body
LE: loop exit
PB: predicated region body
PF: predicated region fallthrough
CT: control target
= control target key end

     0   :  { %16 = vsyncpa [#allocation5], 0  ;;  %s2825_s0 = inlined_call_operand.vmem [shape: bf16[64,128], index: 0, kind: input, shape index: {}]   ;;  %s2826_s1 = inlined_call_operand.vmem [shape: bf16[128,128], index: 1, kind: input, shape index: {}]   ;;  %s2827_s2 = inlined_call_operand.hbm [shape: bf16[128,128], index: 2, kind: input, shape index: {}]   ;;  %s2828_s3 = inlined_call_operand.hbm [shape: bf16[128,128], index: 3, kind: input, shape index: {}]   ;;  %s2829_s4 = inlined_call_operand.hbm [shape: bf16[128,128], index: 4, kind: input, shape index: {}]   ;;  %s2830_s5 = inlined_call_operand.vmem [shape: f32[1,128], index: 5, kind: input, shape index: {}]   ;;  %s2831_s6 = inlined_call_operand.vmem [shape: f32[1,128], index: 6, kind: input, shape index: {}]   ;;  %s2832_s7 = inlined_call_operand.hbm [shape: bf16[128,128], index: 7, kind: input, shape index: {}]   ;;  %s2833_s8 = inlined_call_operand.vmem [shape: f32[1,128], index: 8, kind: input, shape index: {}]   ;;  %s2834_s9 = inlined_call_operand.vmem [shape: f32[64,128], index: 9, kind: output, shape index: {0}]   ;;  %s2835_s10 = inlined_call_operand.vmem [shape: f32[2,8,128], index: 10, kind: output, shape index: {1}]  }
   0x1   :  { %17 = vsyncpa [#allocation7], 0 }
   0x2   :  { %18 = vsyncpa [#allocation10], 0  ;;  %s2297_s13 = smov [#allocation6]   ;;  %s2298_s15 = smov [#allocation4]  }
   0x3   :  { %s40_s14 = sshll.u32 %s2297_s13, 4  ;;  %s28_s16 = sshll.u32 %s2298_s15, 4  ;;  %s41_s14 = int_to_ptr.vmem [resolvable:$true] %s40_s14  ;;  %s29_s16 = int_to_ptr.vmem [resolvable:$true] %s28_s16 }
   0x4   :  { %s2219_s17 = scalar_lea.vmem %s41_s14, 1024  ;;  %p2224_p1 = scmp.lt.s32.totalorder %s41_s14, %s41_s14 }
   0x5   :  { %p2220_p0 = scmp.ne.s32.totalorder %s41_s14, %s2219_s17  ;;  %p2225_p2 = scmp.lt.s32.totalorder %s2219_s17, %s2219_s17 }
   0x7   :  { %p2226_p3 = por %p2225_p2, %p2224_p1 }
   0x9   :  { %p2227_p4 = pnand %p2226_p3, %p2220_p0 }
   0xb   :  { %2230 = shalt.err (!%p2227_p4)
}
   0xc   :  { %s2299_s18 = smov 64   ;;  %s2300_s19 = smov 4  }
   0xd   :  { %46 = dma.hbm_to_vmem [thread:$0]  %s2828_s3, 1024, %s41_s14, [#allocation7], %s2299_s18, %s2299_s18, %s2300_s19  }
   0xe   :  { %s2239_s22 = scalar_lea.vmem %s29_s16, 1024  ;;  %p2244_p6 = scmp.lt.s32.totalorder %s29_s16, %s29_s16 }
   0xf   :  { %p2240_p5 = scmp.ne.s32.totalorder %s29_s16, %s2239_s22  ;;  %p2245_p7 = scmp.lt.s32.totalorder %s2239_s22, %s2239_s22 }
  0x11   :  { %p2246_p8 = por %p2245_p7, %p2244_p6 }
  0x13   :  { %p2247_p9 = pnand %p2246_p8, %p2240_p5 }
  0x15   :  { %2250 = shalt.err (!%p2247_p9)
}
  0x16   :  { %34 = dma.hbm_to_vmem [thread:$0]  %s2827_s2, 1024, %s29_s16, [#allocation5], %s2299_s18, %s2299_s18, %s2300_s19  }
  0x17   :  { %s2301_s25 = smov [#allocation8]   ;;  %s2302_s27 = smov [#allocation9]  }
  0x18   :  { %s52_s26 = sshll.u32 %s2301_s25, 4  ;;  %s68_s28 = sshll.u32 %s2302_s27, 4  ;;  %s53_s26 = int_to_ptr.vmem [resolvable:$true] %s52_s26  ;;  %s69_s28 = int_to_ptr.vmem [resolvable:$true] %s68_s28 }
  0x19   :  { %s2259_s3 = scalar_lea.vmem %s53_s26, 1024  ;;  %p2264_p11 = scmp.lt.s32.totalorder %s53_s26, %s53_s26 }
  0x1a   :  { %p2260_p10 = scmp.ne.s32.totalorder %s53_s26, %s2259_s3  ;;  %p2265_p12 = scmp.lt.s32.totalorder %s2259_s3, %s2259_s3 }
  0x1c   :  { %p2266_p13 = por %p2265_p12, %p2264_p11 }
  0x1e   :  { %p2267_p0 = pnand %p2266_p13, %p2260_p10 }
  0x20   :  { %2270 = shalt.err (!%p2267_p0)
}
  0x21   :  { %58 = dma.hbm_to_vmem [thread:$0]  %s2829_s4, 1024, %s53_s26, [#allocation7], %s2299_s18, %s2299_s18, %s2300_s19  }
  0x22   :  { %s2279_s2 = scalar_lea.vmem %s69_s28, 1024  ;;  %p2284_p2 = scmp.lt.s32.totalorder %s69_s28, %s69_s28 }
  0x23   :  { %p2280_p1 = scmp.ne.s32.totalorder %s69_s28, %s2279_s2  ;;  %p2285_p3 = scmp.lt.s32.totalorder %s2279_s2, %s2279_s2 }
  0x25   :  { %p2286_p4 = por %p2285_p3, %p2284_p2 }
  0x27   :  { %p2287_p5 = pnand %p2286_p4, %p2280_p1 }
  0x29   :  { %2290 = shalt.err (!%p2287_p5)
}
  0x2a   :  { %74 = dma.hbm_to_vmem [thread:$0]  %s2832_s7, 1024, %s69_s28, [#allocation10], %s2299_s18, %s2299_s18, %s2300_s19  }
  0x2b   :  { %2291 = dma.done.wait [#allocation5], 1024  }
  0x2c   :  { %2292 = vsyncadd [#allocation5], 4294966272 }
  0x2d   :  { %2293 = dma.done.wait [#allocation7], 2048  }
  0x2e   :  { %2294 = vsyncadd [#allocation7], 4294965248 }
  0x2f   :  { %2295 = dma.done.wait [#allocation10], 1024  }
  0x30   :  { %2296 = vsyncadd [#allocation10], 4294966272  ;;  %v2303_v0 = vmov 0.0   ;;  %vm2304_vm0 = vmmov 0   ;;  %v2127_v1 = vld [vmem:[%s2826_s1 + $0x38] sm:$0xff]   ;;  %v2128_v2 = vld [vmem:[%s2826_s1 + $0x30] sm:$0xff]  }
  0x31   :  { %1771 = vmatprep.subr.bf16.mxu0 %v2303_v0  ;;  %1787 = vmatprep.mubr.msk.bf16.mxu0 %vm2304_vm0, %v2303_v0  ;;  %v2129_v3 = vld [vmem:[%s2826_s1 + $0x28] sm:$0xff]   ;;  %v2130_v4 = vld [vmem:[%s2826_s1 + $0x20] sm:$0xff]   ;;  %v2403_v6 = vld [vmem:[#allocation6 + $0x38] sm:$0xff]   ;;  %v2305_v21 = vmov 0.0|0.0  }
  0x32   :  { %1727 = vmatprep.subr.bf16.mxu1 %v2127_v1  ;;  %v2135_v5 = vld [vmem:[%s2825_s0] sm:$0xff]   ;;  %v2131_v7 = vld [vmem:[%s2826_s1 + $0x18] sm:$0xff]   ;;  %1772 = vmatpush3.bf16.msra.mxu0 %v2403_v6  ;;  %v2410_v8 = vld [vmem:[#allocation6 + $0x30] sm:$0xff]  }
  0x33   :  { %1728 = vmatpush3.bf16.msra.mxu1 %v2127_v1  ;;  %1743 = vmatprep.mubr.bf16.mxu1 %v2135_v5  ;;  %v2132_v9 = vld [vmem:[%s2826_s1 + $0x10] sm:$0xff]   ;;  %v2417_v10 = vld [vmem:[#allocation6 + $0x28] sm:$0xff]   ;;  %v2422_v12 = vld [vmem:[#allocation6 + $0x20] sm:$0xff]  }
  0x34   :  { %1729 = vmatprep.subr.bf16.mxu1 %v2128_v2  ;;  %1773 = vmatprep.subr.bf16.mxu0 %v2303_v0  ;;  %v2133_v11 = vld [vmem:[%s2826_s1 + $0x8] sm:$0xff]   ;;  %v2134_v13 = vld [vmem:[%s2826_s1] sm:$0xff]   ;;  %v2429_v14 = vld [vmem:[#allocation6 + $0x18] sm:$0xff]  }
  0x35   :  { %v2136_v15 = vld [vmem:[%s2825_s0 + $0x8] sm:$0xff]   ;;  %v2436_v16 = vld [vmem:[#allocation6 + $0x10] sm:$0xff]   ;;  %v2143_v19 = vld [vmem:[%s2825_s0 + $0x18] sm:$0xff]  }
  0x36   :  { %1774 = vmatpush3.bf16.msra.mxu0 %v2410_v8  ;;  %v2141_v17 = vld [vmem:[%s2825_s0 + $0x10] sm:$0xff]   ;;  %v2444_v18 = vld [vmem:[#allocation6 + $0x8] sm:$0xff]   ;;  %v2455_v20 = vld [vmem:[#allocation6] sm:$0xff]  }
  0x37   :  { %1730 = vmatpush3.bf16.msra.mxu1 %v2128_v2  ;;  %1775 = vmatprep.subr.bf16.mxu0 %v2303_v0  ;;  %v1490_v22 = vld [vmem:[%s2830_s5] ss:$0 sm:$0xff] }
  0x38   :  { %1731 = vmatprep.subr.bf16.mxu1 %v2129_v3 }
  0x3a   :  { %1776 = vmatpush3.bf16.msra.mxu0 %v2417_v10 }
  0x3b   :  { %1732 = vmatpush3.bf16.msra.mxu1 %v2129_v3  ;;  %1777 = vmatprep.subr.bf16.mxu0 %v2303_v0 }
  0x3c   :  { %1733 = vmatprep.subr.bf16.mxu1 %v2130_v4 }
  0x3e   :  { %1778 = vmatpush3.bf16.msra.mxu0 %v2422_v12 }
  0x3f   :  { %1734 = vmatpush3.bf16.msra.mxu1 %v2130_v4  ;;  %1779 = vmatprep.subr.bf16.mxu0 %v2303_v0 }
  0x40   :  { %1735 = vmatprep.subr.bf16.mxu1 %v2131_v7 }
  0x42   :  { %1780 = vmatpush3.bf16.msra.mxu0 %v2429_v14 }
  0x43   :  { %1736 = vmatpush3.bf16.msra.mxu1 %v2131_v7  ;;  %1781 = vmatprep.subr.bf16.mxu0 %v2303_v0 }
  0x44   :  { %1737 = vmatprep.subr.bf16.mxu1 %v2132_v9 }
  0x46   :  { %1782 = vmatpush3.bf16.msra.mxu0 %v2436_v16 }
  0x47   :  { %1738 = vmatpush3.bf16.msra.mxu1 %v2132_v9  ;;  %1783 = vmatprep.subr.bf16.mxu0 %v2303_v0 }
  0x48   :  { %1739 = vmatprep.subr.bf16.mxu1 %v2133_v11 }
  0x4a   :  { %1784 = vmatpush3.bf16.msra.mxu0 %v2444_v18 }
  0x4b   :  { %1740 = vmatpush3.bf16.msra.mxu1 %v2133_v11  ;;  %1785 = vmatprep.subr.bf16.mxu0 %v2303_v0 }
  0x4c   :  { %1741 = vmatprep.subr.bf16.mxu1 %v2134_v13 }
  0x4e   :  { %1786 = vmatpush3.bf16.msra.mxu0 %v2455_v20 }
  0x4f   :  { %1742 = vmatpush3.bf16.msra.mxu1 %v2134_v13  ;;  %1811 = vmatprep.subr.bf16.mxu0 %v2303_v0 }
  0x50   :  { %1751 = vmatprep.subr.bf16.mxu1 %v2303_v0 }
  0x52   :  { %1744 = vmatmul.mubr.bf16.vlgmr.msra.gmra.mxu1 %v2136_v15 }
  0x53   :  { %1752 = vmatpush3.bf16.msra.mxu1 %v2403_v6  ;;  %1747 = vmatprep.mubr.bf16.mxu1 %v2141_v17 }
  0x54   :  { %1753 = vmatprep.subr.bf16.mxu1 %v2303_v0 }
  0x57   :  { %1754 = vmatpush3.bf16.msra.mxu1 %v2410_v8 }
  0x58   :  { %1755 = vmatprep.subr.bf16.mxu1 %v2303_v0 }
  0x5a   :  { %1748 = vmatmul.mubr.bf16.gmra.mxu1 %v2143_v19 }
  0x5b   :  { %1756 = vmatpush3.bf16.msra.mxu1 %v2417_v10  ;;  %1767 = vmatprep.mubr.msk.bf16.mxu1 %vm2304_vm0, %v2303_v0 }
  0x5c   :  { %1757 = vmatprep.subr.bf16.mxu1 %v2303_v0 }
  0x5f   :  { %1758 = vmatpush3.bf16.msra.mxu1 %v2422_v12 }
  0x60   :  { %1759 = vmatprep.subr.bf16.mxu1 %v2303_v0 }
  0x63   :  { %1760 = vmatpush3.bf16.msra.mxu1 %v2429_v14 }
  0x64   :  { %1761 = vmatprep.subr.bf16.mxu1 %v2303_v0 }
  0x67   :  { %1762 = vmatpush3.bf16.msra.mxu1 %v2436_v16 }
  0x68   :  { %1763 = vmatprep.subr.bf16.mxu1 %v2303_v0 }
  0x6b   :  { %1764 = vmatpush3.bf16.msra.mxu1 %v2444_v18 }
  0x6c   :  { %1765 = vmatprep.subr.bf16.mxu1 %v2303_v0 }
  0x6f   :  { %1766 = vmatpush3.bf16.msra.mxu1 %v2455_v20 }
  0x70   :  { %1791 = vmatprep.subr.bf16.mxu1 %v2303_v0 }
  0x72   :  { %1768 = vmatmul.mubr.bf16.vlgmr.msra.gmra.mxu1 %v2305_v21 }
  0x73   :  { %1792 = vmatpush3.bf16.msra.mxu1 %v2403_v6  ;;  %1807 = vmatprep.mubr.msk.bf16.mxu1 %vm2304_vm0, %v2303_v0 }
  0x74   :  { %1793 = vmatprep.subr.bf16.mxu1 %v2303_v0 }
  0x77   :  { %1794 = vmatpush3.bf16.msra.mxu1 %v2410_v8 }
  0x78   :  { %1795 = vmatprep.subr.bf16.mxu1 %v2303_v0 }
  0x7b   :  { %1796 = vmatpush3.bf16.msra.mxu1 %v2417_v10 }
  0x7c   :  { %1797 = vmatprep.subr.bf16.mxu1 %v2303_v0 }
  0x7f   :  { %1798 = vmatpush3.bf16.msra.mxu1 %v2422_v12 }
  0x80   :  { %1799 = vmatprep.subr.bf16.mxu1 %v2303_v0 }
  0x83   :  { %1800 = vmatpush3.bf16.msra.mxu1 %v2429_v14 }
  0x84   :  { %1801 = vmatprep.subr.bf16.mxu1 %v2303_v0 }
  0x87   :  { %1802 = vmatpush3.bf16.msra.mxu1 %v2436_v16 }
  0x88   :  { %1803 = vmatprep.subr.bf16.mxu1 %v2303_v0 }
  0x8b   :  { %1804 = vmatpush3.bf16.msra.mxu1 %v2444_v18 }
  0x8c   :  { %1805 = vmatprep.subr.bf16.mxu1 %v2303_v0 }
  0x8f   :  { %1806 = vmatpush3.bf16.msra.mxu1 %v2455_v20 }
  0x90   :  { %1831 = vmatprep.subr.bf16.mxu1 %v2303_v0 }
 0x112   :  { %v1745_v23 = vpop.f32.mrf.mxu1 }
 0x113   :  { %v2497_v24 = vadd.f32 %v1745_v23, %v1490_v22 }
 0x114   :  { %v233_v25 = vpop.f32.mrf.mxu1 }
 0x115   :  { %v234_v38 = vadd.f32 %v1490_v22, %v233_v25  ;;  %v2153_v25 = vld [vmem:[#allocation4 + $0x10] sm:$0xff]  }
 0x116   :  { %v1746_v26 = vpop.f32.mrf.mxu1 }
 0x117   :  { %v2499_v27 = vadd.f32 %v1746_v26, %v1490_v22  ;;  %v2154_v26 = vld [vmem:[#allocation4 + $0x8] sm:$0xff]  }
 0x118   :  { %v236_v28 = vpop.f32.mrf.mxu1 }
 0x119   :  { %v237_v29 = vadd.f32 %v1490_v22, %v236_v28 }
 0x11a   :  { %v1749_v30 = vpop.f32.mrf.mxu1 }
 0x11b   :  { %v2501_v31 = vadd.f32 %v1749_v30, %v1490_v22  ;;  %v2603_v30 = vld [vmem:[#allocation8 + $0x38] sm:$0xff]  }
 0x11c   :  { %v249_v32 = vpop.f32.mrf.mxu1 }
 0x11d   :  { %v2503_v33 = vadd.f32 %v1490_v22, %v249_v32  ;;  %v2607_v32 = vld [vmem:[#allocation8 + $0x30] sm:$0xff]  }
 0x11e   :  { %v1750_v34 = vpop.f32.mrf.mxu1 }
 0x11f   :  { %v2505_v35 = vadd.f32 %v1750_v34, %v1490_v22  ;;  %v2615_v34 = vld [vmem:[#allocation8 + $0x20] sm:$0xff]  }
 0x120   :  { %v252_v36 = vpop.f32.mrf.mxu1 }
 0x121   :  { %v2507_v37 = vadd.f32 %v1490_v22, %v252_v36  ;;  %v2149_v22 = vld [vmem:[#allocation4 + $0x30] sm:$0xff]   ;;  %v2619_v36 = vld [vmem:[#allocation8 + $0x18] sm:$0xff]  }
 0x132   :  { %v373_v39 = vpop.f32.mrf.mxu1 }
 0x133   :  { %v379_v40 = vadd.f32 %v373_v39, %v234_v38  ;;  %v2627_v38 = vld [vmem:[#allocation8 + $0x8] sm:$0xff]   ;;  %v2631_v39 = vld [vmem:[#allocation8] sm:$0xff]  }
 0x134   :  { %v1769_v41 = vpop.f32.mrf.mxu1 }
 0x135   :  { %2179 = vtanh.f32 %v379_v40 }
 0x136   :  { %v376_v42 = vpop.f32.mrf.mxu1 }
 0x138   :  { %v1770_v43 = vpop.f32.mrf.mxu1 }
 0x142   :  { %v2180_v44 = vpop.eup %2179 }
 0x143   :  { %v381_v45 = vpack.c.bf16 %v2180_v44, %v2180_v44 }
 0x145   :  { %382 = vst [vmem:[#allocation3] sm:$0xf] %v381_v45  ;;  %1788 = vmatmul.mubr.bf16.vlgmr.msra.gmra.mxu0 %v381_v45 }
 0x146   :  { %1812 = vmatpush3.bf16.msra.mxu0 %v2403_v6  ;;  %1827 = vmatprep.mubr.msk.bf16.mxu0 %vm2304_vm0, %v2303_v0 }
 0x147   :  { %1813 = vmatprep.subr.bf16.mxu0 %v2303_v0 }
 0x14a   :  { %1814 = vmatpush3.bf16.msra.mxu0 %v2410_v8 }
 0x14b   :  { %1815 = vmatprep.subr.bf16.mxu0 %v2303_v0 }
 0x14e   :  { %1816 = vmatpush3.bf16.msra.mxu0 %v2417_v10 }
 0x14f   :  { %1817 = vmatprep.subr.bf16.mxu0 %v2303_v0 }
 0x152   :  { %1818 = vmatpush3.bf16.msra.mxu0 %v2422_v12 }
 0x153   :  { %1819 = vmatprep.subr.bf16.mxu0 %v2303_v0 }
 0x156   :  { %1820 = vmatpush3.bf16.msra.mxu0 %v2429_v14 }
 0x157   :  { %1821 = vmatprep.subr.bf16.mxu0 %v2303_v0 }
 0x15a   :  { %1822 = vmatpush3.bf16.msra.mxu0 %v2436_v16 }
 0x15b   :  { %1823 = vmatprep.subr.bf16.mxu0 %v2303_v0 }
 0x15e   :  { %1824 = vmatpush3.bf16.msra.mxu0 %v2444_v18 }
 0x15f   :  { %1825 = vmatprep.subr.bf16.mxu0 %v2303_v0 }
 0x162   :  { %1826 = vmatpush3.bf16.msra.mxu0 %v2455_v20 }
 0x163   :  { %1851 = vmatprep.subr.bf16.mxu0 %v2303_v0 }
 0x205   :  { %v418_v46 = vpop.f32.mrf.mxu0 }
 0x206   :  { %v424_v47 = vadd.f32 %v418_v46, %v237_v29 }
 0x207   :  { %v1789_v48 = vpop.f32.mrf.mxu0 }
 0x208   :  { %2181 = vtanh.f32 %v424_v47 }
 0x209   :  { %v421_v49 = vpop.f32.mrf.mxu0 }
 0x20b   :  { %v1790_v50 = vpop.f32.mrf.mxu0 }
 0x215   :  { %v2182_v51 = vpop.eup %2181 }
 0x216   :  { %v426_v52 = vpack.c.bf16 %v2182_v51, %v2182_v51 }
 0x218   :  { %427 = vst [vmem:[#allocation3 + $0x4] sm:$0xf] %v426_v52  ;;  %1808 = vmatmul.mubr.bf16.vlgmr.msra.gmra.mxu1 %v426_v52 }
 0x219   :  { %1832 = vmatpush3.bf16.msra.mxu1 %v2403_v6  ;;  %1847 = vmatprep.mubr.msk.bf16.mxu1 %vm2304_vm0, %v2303_v0 }
 0x21a   :  { %1833 = vmatprep.subr.bf16.mxu1 %v2303_v0 }
 0x21d   :  { %1834 = vmatpush3.bf16.msra.mxu1 %v2410_v8 }
 0x21e   :  { %1835 = vmatprep.subr.bf16.mxu1 %v2303_v0 }
 0x21f   :  { %v2148_v23 = vld [vmem:[#allocation3] sm:$0xff]  }
 0x221   :  { %1836 = vmatpush3.bf16.msra.mxu1 %v2417_v10 }
 0x222   :  { %1837 = vmatprep.subr.bf16.mxu1 %v2303_v0 }
 0x225   :  { %1838 = vmatpush3.bf16.msra.mxu1 %v2422_v12 }
 0x226   :  { %1839 = vmatprep.subr.bf16.mxu1 %v2303_v0 }
 0x229   :  { %1840 = vmatpush3.bf16.msra.mxu1 %v2429_v14 }
 0x22a   :  { %1841 = vmatprep.subr.bf16.mxu1 %v2303_v0 }
 0x22d   :  { %1842 = vmatpush3.bf16.msra.mxu1 %v2436_v16 }
 0x22e   :  { %1843 = vmatprep.subr.bf16.mxu1 %v2303_v0 }
 0x231   :  { %1844 = vmatpush3.bf16.msra.mxu1 %v2444_v18 }
 0x232   :  { %1845 = vmatprep.subr.bf16.mxu1 %v2303_v0 }
 0x235   :  { %1846 = vmatpush3.bf16.msra.mxu1 %v2455_v20 }
 0x236   :  { %1871 = vmatprep.subr.bf16.mxu1 %v2303_v0 }
 0x2d8   :  { %v463_v53 = vpop.f32.mrf.mxu1 }
 0x2d9   :  { %v469_v54 = vadd.f32 %v463_v53, %v2497_v24  ;;  %v2152_v24 = vld [vmem:[#allocation4 + $0x18] sm:$0xff]  }
 0x2da   :  { %v1809_v55 = vpop.f32.mrf.mxu1 }
 0x2db   :  { %2183 = vtanh.f32 %v469_v54 }
 0x2dc   :  { %v466_v56 = vpop.f32.mrf.mxu1 }
 0x2de   :  { %v1810_v57 = vpop.f32.mrf.mxu1 }
 0x2e8   :  { %v2184_v58 = vpop.eup %2183 }
 0x2e9   :  { %v471_v59 = vpack.c.bf16 %v2184_v58, %v2184_v58 }
 0x2eb   :  { %472 = vst [vmem:[#allocation3 + $0x8] sm:$0xf] %v471_v59  ;;  %1828 = vmatmul.mubr.bf16.vlgmr.msra.gmra.mxu0 %v471_v59 }
 0x2ec   :  { %1852 = vmatpush3.bf16.msra.mxu0 %v2403_v6  ;;  %1867 = vmatprep.mubr.msk.bf16.mxu0 %vm2304_vm0, %v2303_v0 }
 0x2ed   :  { %1853 = vmatprep.subr.bf16.mxu0 %v2303_v0 }
 0x2f0   :  { %1854 = vmatpush3.bf16.msra.mxu0 %v2410_v8 }
 0x2f1   :  { %1855 = vmatprep.subr.bf16.mxu0 %v2303_v0 }
 0x2f4   :  { %1856 = vmatpush3.bf16.msra.mxu0 %v2417_v10 }
 0x2f5   :  { %1857 = vmatprep.subr.bf16.mxu0 %v2303_v0 }
 0x2f8   :  { %1858 = vmatpush3.bf16.msra.mxu0 %v2422_v12 }
 0x2f9   :  { %1859 = vmatprep.subr.bf16.mxu0 %v2303_v0 }
 0x2fc   :  { %1860 = vmatpush3.bf16.msra.mxu0 %v2429_v14 }
 0x2fd   :  { %1861 = vmatprep.subr.bf16.mxu0 %v2303_v0 }
 0x300   :  { %1862 = vmatpush3.bf16.msra.mxu0 %v2436_v16 }
 0x301   :  { %1863 = vmatprep.subr.bf16.mxu0 %v2303_v0 }
 0x304   :  { %1864 = vmatpush3.bf16.msra.mxu0 %v2444_v18 }
 0x305   :  { %1865 = vmatprep.subr.bf16.mxu0 %v2303_v0 }
 0x308   :  { %1866 = vmatpush3.bf16.msra.mxu0 %v2455_v20 }
 0x309   :  { %1891 = vmatprep.subr.bf16.mxu0 %v2303_v0 }
 0x3ab   :  { %v508_v60 = vpop.f32.mrf.mxu0 }
 0x3ac   :  { %v514_v61 = vadd.f32 %v508_v60, %v2499_v27  ;;  %v2155_v27 = vld [vmem:[#allocation4] sm:$0xff]  }
 0x3ad   :  { %v1829_v62 = vpop.f32.mrf.mxu0 }
 0x3ae   :  { %2185 = vtanh.f32 %v514_v61 }
 0x3af   :  { %v511_v63 = vpop.f32.mrf.mxu0 }
 0x3b1   :  { %v1830_v1 = vpop.f32.mrf.mxu0 }
 0x3bb   :  { %v2186_v2 = vpop.eup %2185 }
 0x3bc   :  { %v516_v3 = vpack.c.bf16 %v2186_v2, %v2186_v2 }
 0x3be   :  { %517 = vst [vmem:[#allocation3 + $0xc] sm:$0xf] %v516_v3  ;;  %1848 = vmatmul.mubr.bf16.vlgmr.msra.gmra.mxu1 %v516_v3 }
 0x3bf   :  { %1872 = vmatpush3.bf16.msra.mxu1 %v2403_v6  ;;  %1887 = vmatprep.mubr.msk.bf16.mxu1 %vm2304_vm0, %v2303_v0 }
 0x3c0   :  { %1873 = vmatprep.subr.bf16.mxu1 %v2303_v0 }
 0x3c3   :  { %1874 = vmatpush3.bf16.msra.mxu1 %v2410_v8 }
 0x3c4   :  { %1875 = vmatprep.subr.bf16.mxu1 %v2303_v0 }
 0x3c5   :  { %v2156_v28 = vld [vmem:[#allocation3 + $0x8] sm:$0xff]  }
 0x3c7   :  { %1876 = vmatpush3.bf16.msra.mxu1 %v2417_v10 }
 0x3c8   :  { %1877 = vmatprep.subr.bf16.mxu1 %v2303_v0 }
 0x3cb   :  { %1878 = vmatpush3.bf16.msra.mxu1 %v2422_v12 }
 0x3cc   :  { %1879 = vmatprep.subr.bf16.mxu1 %v2303_v0 }
 0x3cf   :  { %1880 = vmatpush3.bf16.msra.mxu1 %v2429_v14 }
 0x3d0   :  { %1881 = vmatprep.subr.bf16.mxu1 %v2303_v0 }
 0x3d3   :  { %1882 = vmatpush3.bf16.msra.mxu1 %v2436_v16 }
 0x3d4   :  { %1883 = vmatprep.subr.bf16.mxu1 %v2303_v0 }
 0x3d7   :  { %1884 = vmatpush3.bf16.msra.mxu1 %v2444_v18 }
 0x3d8   :  { %1885 = vmatprep.subr.bf16.mxu1 %v2303_v0 }
 0x3db   :  { %1886 = vmatpush3.bf16.msra.mxu1 %v2455_v20 }
 0x47e   :  { %v553_v4 = vpop.f32.mrf.mxu1 }
 0x47f   :  { %v559_v5 = vadd.f32 %v553_v4, %v2503_v33  ;;  %v2611_v33 = vld [vmem:[#allocation8 + $0x28] sm:$0xff]  }
 0x480   :  { %v1849_v7 = vpop.f32.mrf.mxu1 }
 0x481   :  { %2187 = vtanh.f32 %v559_v5 }
 0x482   :  { %v556_v9 = vpop.f32.mrf.mxu1 }
 0x484   :  { %v1850_v11 = vpop.f32.mrf.mxu1 }
 0x48e   :  { %v2188_v13 = vpop.eup %2187 }
 0x48f   :  { %v561_v15 = vpack.c.bf16 %v2188_v13, %v2188_v13 }
 0x491   :  { %562 = vst [vmem:[#allocation3 + $0x10] sm:$0xf] %v561_v15  ;;  %1868 = vmatmul.mubr.bf16.vlgmr.msra.gmra.mxu0 %v561_v15 }
 0x492   :  { %1892 = vmatpush3.bf16.msra.mxu0 %v2403_v6  ;;  %1907 = vmatprep.mubr.msk.bf16.mxu0 %vm2304_vm0, %v2303_v0  ;;  %v2147_v6 = vld [vmem:[#allocation4 + $0x38] sm:$0xff]  }
 0x493   :  { %1893 = vmatprep.subr.bf16.mxu0 %v2303_v0  ;;  %1911 = vmatprep.subr.bf16.mxu1 %v2147_v6 }
 0x496   :  { %1894 = vmatpush3.bf16.msra.mxu0 %v2410_v8 }
 0x497   :  { %1895 = vmatprep.subr.bf16.mxu0 %v2303_v0 }
 0x49a   :  { %1896 = vmatpush3.bf16.msra.mxu0 %v2417_v10 }
 0x49b   :  { %1897 = vmatprep.subr.bf16.mxu0 %v2303_v0 }
 0x49e   :  { %1898 = vmatpush3.bf16.msra.mxu0 %v2422_v12 }
 0x49f   :  { %1899 = vmatprep.subr.bf16.mxu0 %v2303_v0 }
 0x4a2   :  { %1900 = vmatpush3.bf16.msra.mxu0 %v2429_v14 }
 0x4a3   :  { %1901 = vmatprep.subr.bf16.mxu0 %v2303_v0 }
 0x4a6   :  { %1902 = vmatpush3.bf16.msra.mxu0 %v2436_v16 }
 0x4a7   :  { %1903 = vmatprep.subr.bf16.mxu0 %v2303_v0 }
 0x4aa   :  { %1904 = vmatpush3.bf16.msra.mxu0 %v2444_v18  ;;  %v2150_v18 = vld [vmem:[#allocation4 + $0x28] sm:$0xff]  }
 0x4ab   :  { %1905 = vmatprep.subr.bf16.mxu0 %v2303_v0 }
 0x4ae   :  { %1906 = vmatpush3.bf16.msra.mxu0 %v2455_v20  ;;  %v2151_v20 = vld [vmem:[#allocation4 + $0x20] sm:$0xff]  }
 0x4af   :  { %1935 = vmatprep.subr.bf16.mxu0 %v2303_v0 }
 0x551   :  { %v598_v8 = vpop.f32.mrf.mxu0 }
 0x552   :  { %v604_v10 = vadd.f32 %v598_v8, %v2507_v37  ;;  %v2623_v37 = vld [vmem:[#allocation8 + $0x10] sm:$0xff]  }
 0x553   :  { %v1869_v12 = vpop.f32.mrf.mxu0 }
 0x554   :  { %2189 = vtanh.f32 %v604_v10 }
 0x555   :  { %v601_v14 = vpop.f32.mrf.mxu0 }
 0x557   :  { %v1870_v17 = vpop.f32.mrf.mxu0 }
 0x561   :  { %v2190_v16 = vpop.eup %2189 }
 0x562   :  { %v606_v19 = vpack.c.bf16 %v2190_v16, %v2190_v16 }
 0x564   :  { %607 = vst [vmem:[#allocation3 + $0x14] sm:$0xf] %v606_v19  ;;  %1888 = vmatmul.mubr.bf16.vlgmr.msra.gmra.mxu1 %v606_v19 }
 0x565   :  { %1912 = vmatpush3.bf16.msra.mxu1 %v2147_v6  ;;  %1927 = vmatprep.mubr.bf16.mxu1 %v2148_v23 }
 0x566   :  { %1913 = vmatprep.subr.bf16.mxu1 %v2149_v22 }
 0x569   :  { %1914 = vmatpush3.bf16.msra.mxu1 %v2149_v22 }
 0x56a   :  { %1915 = vmatprep.subr.bf16.mxu1 %v2150_v18 }
 0x56b   :  { %v2157_v29 = vld [vmem:[#allocation3 + $0x10] sm:$0xff]  }
 0x56d   :  { %1916 = vmatpush3.bf16.msra.mxu1 %v2150_v18 }
 0x56e   :  { %1917 = vmatprep.subr.bf16.mxu1 %v2151_v20 }
 0x571   :  { %1918 = vmatpush3.bf16.msra.mxu1 %v2151_v20 }
 0x572   :  { %1919 = vmatprep.subr.bf16.mxu1 %v2152_v24 }
 0x575   :  { %1920 = vmatpush3.bf16.msra.mxu1 %v2152_v24 }
 0x576   :  { %1921 = vmatprep.subr.bf16.mxu1 %v2153_v25 }
 0x579   :  { %1922 = vmatpush3.bf16.msra.mxu1 %v2153_v25 }
 0x57a   :  { %1923 = vmatprep.subr.bf16.mxu1 %v2154_v26 }
 0x57d   :  { %1924 = vmatpush3.bf16.msra.mxu1 %v2154_v26 }
 0x57e   :  { %1925 = vmatprep.subr.bf16.mxu1 %v2155_v27 }
 0x581   :  { %1926 = vmatpush3.bf16.msra.mxu1 %v2155_v27 }
 0x582   :  { %1955 = vmatprep.subr.bf16.mxu1 %v2303_v0 }
 0x584   :  { %1928 = vmatmul.mubr.bf16.vlgmr.msra.gmra.mxu1 %v2156_v28 }
 0x585   :  { %1931 = vmatprep.mubr.bf16.mxu1 %v2157_v29  ;;  %1956 = vmatpush3.bf16.msra.mxu1 %v2603_v30 }
 0x586   :  { %1957 = vmatprep.subr.bf16.mxu1 %v2303_v0 }
 0x589   :  { %1958 = vmatpush3.bf16.msra.mxu1 %v2607_v32 }
 0x58a   :  { %1959 = vmatprep.subr.bf16.mxu1 %v2303_v0 }
 0x58d   :  { %1960 = vmatpush3.bf16.msra.mxu1 %v2611_v33 }
 0x58e   :  { %1961 = vmatprep.subr.bf16.mxu1 %v2303_v0 }
 0x591   :  { %1962 = vmatpush3.bf16.msra.mxu1 %v2615_v34 }
 0x592   :  { %1963 = vmatprep.subr.bf16.mxu1 %v2303_v0 }
 0x595   :  { %1964 = vmatpush3.bf16.msra.mxu1 %v2619_v36 }
 0x596   :  { %1965 = vmatprep.subr.bf16.mxu1 %v2303_v0 }
 0x599   :  { %1966 = vmatpush3.bf16.msra.mxu1 %v2623_v37 }
 0x59a   :  { %1967 = vmatprep.subr.bf16.mxu1 %v2303_v0 }
 0x59d   :  { %1968 = vmatpush3.bf16.msra.mxu1 %v2627_v38 }
 0x59e   :  { %1969 = vmatprep.subr.bf16.mxu1 %v2303_v0 }
 0x5a1   :  { %1970 = vmatpush3.bf16.msra.mxu1 %v2631_v39 }
 0x5a2   :  { %1995 = vmatprep.subr.bf16.mxu1 %v2303_v0 }
 0x624   :  { %v643_v40 = vpop.f32.mrf.mxu1 }
 0x625   :  { %v649_v41 = vadd.f32 %v643_v40, %v2501_v31 }
 0x626   :  { %v1889_v42 = vpop.f32.mrf.mxu1 }
 0x627   :  { %2191 = vtanh.f32 %v649_v41 }
 0x628   :  { %v646_v43 = vpop.f32.mrf.mxu1 }
 0x62a   :  { %v1890_v44 = vpop.f32.mrf.mxu1 }
 0x634   :  { %v2192_v45 = vpop.eup %2191 }
 0x635   :  { %v651_v46 = vpack.c.bf16 %v2192_v45, %v2192_v45 }
 0x637   :  { %652 = vst [vmem:[#allocation3 + $0x18] sm:$0xf] %v651_v46  ;;  %1908 = vmatmul.mubr.bf16.vlgmr.msra.gmra.mxu0 %v651_v46 }
 0x638   :  { %1936 = vmatpush3.bf16.msra.mxu0 %v2603_v30  ;;  %1951 = vmatprep.mubr.msk.bf16.mxu0 %vm2304_vm0, %v2303_v0 }
 0x639   :  { %1937 = vmatprep.subr.bf16.mxu0 %v2303_v0 }
 0x63c   :  { %1938 = vmatpush3.bf16.msra.mxu0 %v2607_v32 }
 0x63d   :  { %1939 = vmatprep.subr.bf16.mxu0 %v2303_v0 }
 0x640   :  { %1940 = vmatpush3.bf16.msra.mxu0 %v2611_v33 }
 0x641   :  { %1941 = vmatprep.subr.bf16.mxu0 %v2303_v0 }
 0x644   :  { %1942 = vmatpush3.bf16.msra.mxu0 %v2615_v34  ;;  %v2677_v52 = vpop.f32.mrf.mxu1 }
 0x645   :  { %1943 = vmatprep.subr.bf16.mxu0 %v2303_v0 }
 0x646   :  { %v836_v54 = vpop.f32.mrf.mxu1 }
 0x648   :  { %1944 = vmatpush3.bf16.msra.mxu0 %v2619_v36  ;;  %v1930_v63 = vpop.f32.mrf.mxu1 }
 0x649   :  { %1945 = vmatprep.subr.bf16.mxu0 %v2303_v0 }
 0x64a   :  { %v839_v1 = vpop.f32.mrf.mxu1 }
 0x64c   :  { %1946 = vmatpush3.bf16.msra.mxu0 %v2623_v37 }
 0x64d   :  { %1947 = vmatprep.subr.bf16.mxu0 %v2303_v0 }
 0x650   :  { %1948 = vmatpush3.bf16.msra.mxu0 %v2627_v38 }
 0x651   :  { %1949 = vmatprep.subr.bf16.mxu0 %v2303_v0 }
 0x654   :  { %1950 = vmatpush3.bf16.msra.mxu0 %v2631_v39 }
 0x655   :  { %1975 = vmatprep.subr.bf16.mxu0 %v2303_v0 }
 0x657   :  { %1952 = vmatmul.mubr.bf16.vlgmr.msra.gmra.mxu0 %v2305_v21 }
 0x658   :  { %1976 = vmatpush3.bf16.msra.mxu0 %v2603_v30  ;;  %1991 = vmatprep.mubr.msk.bf16.mxu0 %vm2304_vm0, %v2303_v0 }
 0x659   :  { %1977 = vmatprep.subr.bf16.mxu0 %v2303_v0 }
 0x65c   :  { %1978 = vmatpush3.bf16.msra.mxu0 %v2607_v32 }
 0x65d   :  { %1979 = vmatprep.subr.bf16.mxu0 %v2303_v0 }
 0x660   :  { %1980 = vmatpush3.bf16.msra.mxu0 %v2611_v33 }
 0x661   :  { %1981 = vmatprep.subr.bf16.mxu0 %v2303_v0 }
 0x664   :  { %1982 = vmatpush3.bf16.msra.mxu0 %v2615_v34 }
 0x665   :  { %1983 = vmatprep.subr.bf16.mxu0 %v2303_v0 }
 0x668   :  { %1984 = vmatpush3.bf16.msra.mxu0 %v2619_v36 }
 0x669   :  { %1985 = vmatprep.subr.bf16.mxu0 %v2303_v0 }
 0x66c   :  { %1986 = vmatpush3.bf16.msra.mxu0 %v2623_v37 }
 0x66d   :  { %1987 = vmatprep.subr.bf16.mxu0 %v2303_v0 }
 0x670   :  { %1988 = vmatpush3.bf16.msra.mxu0 %v2627_v38 }
 0x671   :  { %1989 = vmatprep.subr.bf16.mxu0 %v2303_v0 }
 0x674   :  { %1990 = vmatpush3.bf16.msra.mxu0 %v2631_v39 }
 0x675   :  { %2015 = vmatprep.subr.bf16.mxu0 %v2303_v0 }
 0x6f7   :  { %v688_v21 = vpop.f32.mrf.mxu0 }
 0x6f8   :  { %v694_v31 = vadd.f32 %v688_v21, %v2505_v35  ;;  %v2684_v35 = vld [vmem:[%s2831_s6] ss:$0 sm:$0xff] }
 0x6f9   :  { %v1909_v47 = vpop.f32.mrf.mxu0  ;;  %v837_v55 = vadd.f32 %v2684_v35, %v836_v54  ;;  %v840_v7 = vadd.f32 %v2684_v35, %v839_v1  ;;  %v845_v12 = vadd.f32 %v2677_v52, %v2684_v35  ;;  %v848_v20 = vadd.f32 %v1930_v63, %v2684_v35  ;;  %v2173_v52 = vld [vmem:[#allocation9 + $0x10] sm:$0xff]   ;;  %v2175_v54 = vld [vmem:[#allocation9] sm:$0xff]  }
 0x6fa   :  { %2193 = vtanh.f32 %v694_v31 }
 0x6fb   :  { %v691_v48 = vpop.f32.mrf.mxu0 }
 0x6fd   :  { %v1910_v49 = vpop.f32.mrf.mxu0 }
 0x707   :  { %v2194_v50 = vpop.eup %2193 }
 0x708   :  { %v696_v51 = vpack.c.bf16 %v2194_v50, %v2194_v50  ;;  %698 = vst [vmem:[%s2835_s10] sm:$0xff] %v2194_v50  ;;  %v2169_v50 = vld [vmem:[#allocation9 + $0x30] sm:$0xff]  }
 0x70a   :  { %697 = vst [vmem:[#allocation3 + $0x1c] sm:$0xf] %v696_v51 }
 0x711   :  { %v2166_v53 = vld [vmem:[#allocation3 + $0x18] sm:$0xff]  }
 0x712   :  { %1932 = vmatmul.mubr.bf16.gmra.mxu1 %v2166_v53  ;;  %v2174_v53 = vld [vmem:[#allocation9 + $0x8] sm:$0xff]  }
 0x713   :  { %1971 = vmatprep.mubr.msk.bf16.mxu1 %vm2304_vm0, %v2303_v0 }
 0x717   :  { %v977_v56 = vpop.f32.mrf.mxu0 }
 0x718   :  { %v983_v57 = vadd.f32 %v977_v56, %v837_v55 }
 0x719   :  { %v1953_v58 = vpop.f32.mrf.mxu0 }
 0x71a   :  { %2195 = vtanh.f32 %v983_v57 }
 0x71b   :  { %v980_v59 = vpop.f32.mrf.mxu0 }
 0x71d   :  { %v1954_v60 = vpop.f32.mrf.mxu0 }
 0x727   :  { %v2196_v61 = vpop.eup %2195 }
 0x728   :  { %v985_v62 = vpack.c.bf16 %v2196_v61, %v2196_v61 }
 0x72a   :  { %986 = vst [vmem:[#allocation3] sm:$0xf] %v985_v62  ;;  %1972 = vmatmul.mubr.bf16.vlgmr.msra.gmra.mxu1 %v985_v62 }
 0x72b   :  { %1996 = vmatpush3.bf16.msra.mxu1 %v2603_v30  ;;  %2011 = vmatprep.mubr.msk.bf16.mxu1 %vm2304_vm0, %v2303_v0 }
 0x72c   :  { %1997 = vmatprep.subr.bf16.mxu1 %v2303_v0 }
 0x72f   :  { %1998 = vmatpush3.bf16.msra.mxu1 %v2607_v32 }
 0x730   :  { %1999 = vmatprep.subr.bf16.mxu1 %v2303_v0 }
 0x733   :  { %2000 = vmatpush3.bf16.msra.mxu1 %v2611_v33 }
 0x734   :  { %2001 = vmatprep.subr.bf16.mxu1 %v2303_v0 }
 0x737   :  { %2002 = vmatpush3.bf16.msra.mxu1 %v2615_v34 }
 0x738   :  { %2003 = vmatprep.subr.bf16.mxu1 %v2303_v0 }
 0x73b   :  { %2004 = vmatpush3.bf16.msra.mxu1 %v2619_v36 }
 0x73c   :  { %2005 = vmatprep.subr.bf16.mxu1 %v2303_v0 }
 0x73f   :  { %2006 = vmatpush3.bf16.msra.mxu1 %v2623_v37 }
 0x740   :  { %2007 = vmatprep.subr.bf16.mxu1 %v2303_v0 }
 0x743   :  { %2008 = vmatpush3.bf16.msra.mxu1 %v2627_v38 }
 0x744   :  { %2009 = vmatprep.subr.bf16.mxu1 %v2303_v0 }
 0x747   :  { %2010 = vmatpush3.bf16.msra.mxu1 %v2631_v39 }
 0x748   :  { %2035 = vmatprep.subr.bf16.mxu1 %v2303_v0 }
 0x7d2   :  { %v2705_v2 = vpop.f32.mrf.mxu1 }
 0x7d3   :  { %v861_v57 = vadd.f32 %v2705_v2, %v2684_v35 }
 0x7d4   :  { %v2707_v3 = vpop.f32.mrf.mxu1 }
 0x7d5   :  { %v853_v41 = vadd.f32 %v2684_v35, %v2707_v3  ;;  %v1534_v3 = vld [vmem:[%s2833_s8] ss:$0 sm:$0xff] }
 0x7d6   :  { %v2709_v4 = vpop.f32.mrf.mxu1 }
 0x7d8   :  { %v2711_v5 = vpop.f32.mrf.mxu1 }
 0x7ea   :  { %v1022_v9 = vpop.f32.mrf.mxu1 }
 0x7eb   :  { %v1028_v11 = vadd.f32 %v1022_v9, %v840_v7 }
 0x7ec   :  { %v1973_v13 = vpop.f32.mrf.mxu1 }
 0x7ed   :  { %2197 = vtanh.f32 %v1028_v11 }
 0x7ee   :  { %v1025_v15 = vpop.f32.mrf.mxu1 }
 0x7f0   :  { %v1974_v6 = vpop.f32.mrf.mxu1 }
 0x7fa   :  { %v2198_v8 = vpop.eup %2197 }
 0x7fb   :  { %v1030_v10 = vpack.c.bf16 %v2198_v8, %v2198_v8  ;;  %v864_v8 = vadd.f32 %v2709_v4, %v2684_v35 }
 0x7fd   :  { %1031 = vst [vmem:[#allocation3 + $0x4] sm:$0xf] %v1030_v10  ;;  %1992 = vmatmul.mubr.bf16.vlgmr.msra.gmra.mxu0 %v1030_v10 }
 0x7fe   :  { %2016 = vmatpush3.bf16.msra.mxu0 %v2603_v30  ;;  %2031 = vmatprep.mubr.msk.bf16.mxu0 %vm2304_vm0, %v2303_v0 }
 0x7ff   :  { %2017 = vmatprep.subr.bf16.mxu0 %v2303_v0 }
 0x802   :  { %2018 = vmatpush3.bf16.msra.mxu0 %v2607_v32 }
 0x803   :  { %2019 = vmatprep.subr.bf16.mxu0 %v2303_v0 }
 0x804   :  { %v2168_v51 = vld [vmem:[#allocation3] sm:$0xff]  }
 0x806   :  { %2020 = vmatpush3.bf16.msra.mxu0 %v2611_v33 }
 0x807   :  { %2021 = vmatprep.subr.bf16.mxu0 %v2303_v0 }
 0x80a   :  { %2022 = vmatpush3.bf16.msra.mxu0 %v2615_v34 }
 0x80b   :  { %2023 = vmatprep.subr.bf16.mxu0 %v2303_v0 }
 0x80e   :  { %2024 = vmatpush3.bf16.msra.mxu0 %v2619_v36 }
 0x80f   :  { %2025 = vmatprep.subr.bf16.mxu0 %v2303_v0 }
 0x812   :  { %2026 = vmatpush3.bf16.msra.mxu0 %v2623_v37 }
 0x813   :  { %2027 = vmatprep.subr.bf16.mxu0 %v2303_v0 }
 0x816   :  { %2028 = vmatpush3.bf16.msra.mxu0 %v2627_v38 }
 0x817   :  { %2029 = vmatprep.subr.bf16.mxu0 %v2303_v0 }
 0x81a   :  { %2030 = vmatpush3.bf16.msra.mxu0 %v2631_v39 }
 0x81b   :  { %2055 = vmatprep.subr.bf16.mxu0 %v2303_v0 }
 0x8bd   :  { %v1067_v14 = vpop.f32.mrf.mxu0 }
 0x8be   :  { %v1073_v17 = vadd.f32 %v1067_v14, %v845_v12 }
 0x8bf   :  { %v1993_v16 = vpop.f32.mrf.mxu0 }
 0x8c0   :  { %2199 = vtanh.f32 %v1073_v17 }
 0x8c1   :  { %v1070_v19 = vpop.f32.mrf.mxu0 }
 0x8c3   :  { %v1994_v22 = vpop.f32.mrf.mxu0 }
 0x8cd   :  { %v2200_v23 = vpop.eup %2199 }
 0x8ce   :  { %v1075_v18 = vpack.c.bf16 %v2200_v23, %v2200_v23 }
 0x8d0   :  { %1076 = vst [vmem:[#allocation3 + $0x8] sm:$0xf] %v1075_v18  ;;  %2012 = vmatmul.mubr.bf16.vlgmr.msra.gmra.mxu1 %v1075_v18 }
 0x8d1   :  { %2036 = vmatpush3.bf16.msra.mxu1 %v2603_v30  ;;  %2051 = vmatprep.mubr.msk.bf16.mxu1 %vm2304_vm0, %v2303_v0 }
 0x8d2   :  { %2037 = vmatprep.subr.bf16.mxu1 %v2303_v0 }
 0x8d5   :  { %2038 = vmatpush3.bf16.msra.mxu1 %v2607_v32 }
 0x8d6   :  { %2039 = vmatprep.subr.bf16.mxu1 %v2303_v0 }
 0x8d9   :  { %2040 = vmatpush3.bf16.msra.mxu1 %v2611_v33 }
 0x8da   :  { %2041 = vmatprep.subr.bf16.mxu1 %v2303_v0 }
 0x8dd   :  { %2042 = vmatpush3.bf16.msra.mxu1 %v2615_v34 }
 0x8de   :  { %2043 = vmatprep.subr.bf16.mxu1 %v2303_v0 }
 0x8e1   :  { %2044 = vmatpush3.bf16.msra.mxu1 %v2619_v36 }
 0x8e2   :  { %2045 = vmatprep.subr.bf16.mxu1 %v2303_v0 }
 0x8e5   :  { %2046 = vmatpush3.bf16.msra.mxu1 %v2623_v37 }
 0x8e6   :  { %2047 = vmatprep.subr.bf16.mxu1 %v2303_v0 }
 0x8e9   :  { %2048 = vmatpush3.bf16.msra.mxu1 %v2627_v38 }
 0x8ea   :  { %2049 = vmatprep.subr.bf16.mxu1 %v2303_v0 }
 0x8ed   :  { %2050 = vmatpush3.bf16.msra.mxu1 %v2631_v39 }
 0x8ee   :  { %2075 = vmatprep.subr.bf16.mxu1 %v2303_v0 }
 0x990   :  { %v1112_v24 = vpop.f32.mrf.mxu1 }
 0x991   :  { %v1118_v25 = vadd.f32 %v1112_v24, %v848_v20 }
 0x992   :  { %v2013_v26 = vpop.f32.mrf.mxu1 }
 0x993   :  { %2201 = vtanh.f32 %v1118_v25 }
 0x994   :  { %v1115_v27 = vpop.f32.mrf.mxu1 }
 0x996   :  { %v2014_v28 = vpop.f32.mrf.mxu1 }
 0x9a0   :  { %v2202_v29 = vpop.eup %2201 }
 0x9a1   :  { %v1120_v40 = vpack.c.bf16 %v2202_v29, %v2202_v29 }
 0x9a3   :  { %1121 = vst [vmem:[#allocation3 + $0xc] sm:$0xf] %v1120_v40  ;;  %2032 = vmatmul.mubr.bf16.vlgmr.msra.gmra.mxu0 %v1120_v40 }
 0x9a4   :  { %2056 = vmatpush3.bf16.msra.mxu0 %v2603_v30  ;;  %2071 = vmatprep.mubr.msk.bf16.mxu0 %vm2304_vm0, %v2303_v0 }
 0x9a5   :  { %2057 = vmatprep.subr.bf16.mxu0 %v2303_v0 }
 0x9a8   :  { %2058 = vmatpush3.bf16.msra.mxu0 %v2607_v32 }
 0x9a9   :  { %2059 = vmatprep.subr.bf16.mxu0 %v2303_v0 }
 0x9aa   :  { %v2176_v55 = vld [vmem:[#allocation3 + $0x8] sm:$0xff]  }
 0x9ac   :  { %2060 = vmatpush3.bf16.msra.mxu0 %v2611_v33 }
 0x9ad   :  { %2061 = vmatprep.subr.bf16.mxu0 %v2303_v0 }
 0x9b0   :  { %2062 = vmatpush3.bf16.msra.mxu0 %v2615_v34 }
 0x9b1   :  { %2063 = vmatprep.subr.bf16.mxu0 %v2303_v0 }
 0x9b4   :  { %2064 = vmatpush3.bf16.msra.mxu0 %v2619_v36 }
 0x9b5   :  { %2065 = vmatprep.subr.bf16.mxu0 %v2303_v0 }
 0x9b8   :  { %2066 = vmatpush3.bf16.msra.mxu0 %v2623_v37 }
 0x9b9   :  { %2067 = vmatprep.subr.bf16.mxu0 %v2303_v0 }
 0x9bc   :  { %2068 = vmatpush3.bf16.msra.mxu0 %v2627_v38 }
 0x9bd   :  { %2069 = vmatprep.subr.bf16.mxu0 %v2303_v0 }
 0x9c0   :  { %2070 = vmatpush3.bf16.msra.mxu0 %v2631_v39 }
 0xa63   :  { %v1157_v42 = vpop.f32.mrf.mxu0 }
 0xa64   :  { %v1163_v43 = vadd.f32 %v1157_v42, %v853_v41 }
 0xa65   :  { %v2033_v44 = vpop.f32.mrf.mxu0 }
 0xa66   :  { %2203 = vtanh.f32 %v1163_v43 }
 0xa67   :  { %v1160_v45 = vpop.f32.mrf.mxu0 }
 0xa69   :  { %v2034_v46 = vpop.f32.mrf.mxu0 }
 0xa73   :  { %v2204_v21 = vpop.eup %2203 }
 0xa74   :  { %v1165_v31 = vpack.c.bf16 %v2204_v21, %v2204_v21 }
 0xa76   :  { %1166 = vst [vmem:[#allocation3 + $0x10] sm:$0xf] %v1165_v31  ;;  %2052 = vmatmul.mubr.bf16.vlgmr.msra.gmra.mxu1 %v1165_v31 }
 0xa77   :  { %2076 = vmatpush3.bf16.msra.mxu1 %v2603_v30  ;;  %2091 = vmatprep.mubr.msk.bf16.mxu1 %vm2304_vm0, %v2303_v0  ;;  %v2167_v30 = vld [vmem:[#allocation9 + $0x38] sm:$0xff]  }
 0xa78   :  { %2077 = vmatprep.subr.bf16.mxu1 %v2303_v0  ;;  %2095 = vmatprep.subr.bf16.mxu0 %v2167_v30 }
 0xa7b   :  { %2078 = vmatpush3.bf16.msra.mxu1 %v2607_v32  ;;  %v856_v32 = vadd.f32 %v2684_v35, %v2711_v5 }
 0xa7c   :  { %2079 = vmatprep.subr.bf16.mxu1 %v2303_v0 }
 0xa7f   :  { %2080 = vmatpush3.bf16.msra.mxu1 %v2611_v33 }
 0xa80   :  { %2081 = vmatprep.subr.bf16.mxu1 %v2303_v0 }
 0xa83   :  { %2082 = vmatpush3.bf16.msra.mxu1 %v2615_v34 }
 0xa84   :  { %2083 = vmatprep.subr.bf16.mxu1 %v2303_v0 }
 0xa87   :  { %2084 = vmatpush3.bf16.msra.mxu1 %v2619_v36 }
 0xa88   :  { %2085 = vmatprep.subr.bf16.mxu1 %v2303_v0 }
 0xa8b   :  { %2086 = vmatpush3.bf16.msra.mxu1 %v2623_v37 }
 0xa8c   :  { %2087 = vmatprep.subr.bf16.mxu1 %v2303_v0 }
 0xa8f   :  { %2088 = vmatpush3.bf16.msra.mxu1 %v2627_v38  ;;  %v2171_v38 = vld [vmem:[#allocation9 + $0x20] sm:$0xff]  }
 0xa90   :  { %2089 = vmatprep.subr.bf16.mxu1 %v2303_v0  ;;  %v2170_v0 = vld [vmem:[#allocation9 + $0x28] sm:$0xff]  }
 0xa93   :  { %2090 = vmatpush3.bf16.msra.mxu1 %v2631_v39  ;;  %v2172_v39 = vld [vmem:[#allocation9 + $0x18] sm:$0xff]  }
 0xb36   :  { %v1202_v33 = vpop.f32.mrf.mxu1 }
 0xb37   :  { %v1208_v34 = vadd.f32 %v1202_v33, %v856_v32 }
 0xb38   :  { %v2053_v36 = vpop.f32.mrf.mxu1 }
 0xb39   :  { %2205 = vtanh.f32 %v1208_v34 }
 0xb3a   :  { %v1205_v47 = vpop.f32.mrf.mxu1 }
 0xb3c   :  { %v2054_v48 = vpop.f32.mrf.mxu1 }
 0xb46   :  { %v2206_v37 = vpop.eup %2205 }
 0xb47   :  { %v1210_v49 = vpack.c.bf16 %v2206_v37, %v2206_v37 }
 0xb49   :  { %1211 = vst [vmem:[#allocation3 + $0x14] sm:$0xf] %v1210_v49  ;;  %2072 = vmatmul.mubr.bf16.vlgmr.msra.gmra.mxu0 %v1210_v49 }
 0xb4a   :  { %2096 = vmatpush3.bf16.msra.mxu0 %v2167_v30  ;;  %2111 = vmatprep.mubr.bf16.mxu0 %v2168_v51 }
 0xb4b   :  { %2097 = vmatprep.subr.bf16.mxu0 %v2169_v50 }
 0xb4e   :  { %2098 = vmatpush3.bf16.msra.mxu0 %v2169_v50 }
 0xb4f   :  { %2099 = vmatprep.subr.bf16.mxu0 %v2170_v0 }
 0xb50   :  { %v2177_v56 = vld [vmem:[#allocation3 + $0x10] sm:$0xff]  }
 0xb52   :  { %2100 = vmatpush3.bf16.msra.mxu0 %v2170_v0 }
 0xb53   :  { %2101 = vmatprep.subr.bf16.mxu0 %v2171_v38 }
 0xb56   :  { %2102 = vmatpush3.bf16.msra.mxu0 %v2171_v38 }
 0xb57   :  { %2103 = vmatprep.subr.bf16.mxu0 %v2172_v39 }
 0xb5a   :  { %2104 = vmatpush3.bf16.msra.mxu0 %v2172_v39 }
 0xb5b   :  { %2105 = vmatprep.subr.bf16.mxu0 %v2173_v52 }
 0xb5e   :  { %2106 = vmatpush3.bf16.msra.mxu0 %v2173_v52 }
 0xb5f   :  { %2107 = vmatprep.subr.bf16.mxu0 %v2174_v53 }
 0xb62   :  { %2108 = vmatpush3.bf16.msra.mxu0 %v2174_v53 }
 0xb63   :  { %2109 = vmatprep.subr.bf16.mxu0 %v2175_v54 }
 0xb66   :  { %2110 = vmatpush3.bf16.msra.mxu0 %v2175_v54 }
 0xb69   :  { %2112 = vmatmul.mubr.bf16.vlgmr.msra.gmra.mxu0 %v2176_v55 }
 0xb6a   :  { %2115 = vmatprep.mubr.bf16.mxu0 %v2177_v56 }
 0xc09   :  { %v1247_v58 = vpop.f32.mrf.mxu0 }
 0xc0a   :  { %v1253_v59 = vadd.f32 %v1247_v58, %v861_v57 }
 0xc0b   :  { %v2073_v60 = vpop.f32.mrf.mxu0 }
 0xc0c   :  { %2207 = vtanh.f32 %v1253_v59 }
 0xc0d   :  { %v1250_v61 = vpop.f32.mrf.mxu0 }
 0xc0f   :  { %v2074_v62 = vpop.f32.mrf.mxu0 }
 0xc19   :  { %v2208_v63 = vpop.eup %2207 }
 0xc1a   :  { %v1255_v1 = vpack.c.bf16 %v2208_v63, %v2208_v63 }
 0xc1c   :  { %1256 = vst [vmem:[#allocation3 + $0x18] sm:$0xf] %v1255_v1  ;;  %2092 = vmatmul.mubr.bf16.vlgmr.msra.gmra.mxu1 %v1255_v1 }
 0xc29   :  { %v2113_v5 = vpop.f32.mrf.mxu0 }
 0xc2a   :  { %v1449_v7 = vadd.f32 %v2113_v5, %v1534_v3 }
 0xc2b   :  { %v1440_v9 = vpop.f32.mrf.mxu0 }
 0xc2c   :  { %1473 = vst [vmem:[%s2834_s9 + $0x10] sm:$0xff] %v1449_v7  ;;  %v1441_v2 = vadd.f32 %v1534_v3, %v1440_v9 }
 0xc2d   :  { %v2114_v11 = vpop.f32.mrf.mxu0 }
 0xc2e   :  { %1471 = vst [vmem:[%s2834_s9] sm:$0xff] %v1441_v2  ;;  %v1452_v13 = vadd.f32 %v2114_v11, %v1534_v3 }
 0xc2f   :  { %v1443_v15 = vpop.f32.mrf.mxu0 }
 0xc30   :  { %1474 = vst [vmem:[%s2834_s9 + $0x18] sm:$0xff] %v1452_v13  ;;  %v1444_v6 = vadd.f32 %v1534_v3, %v1443_v15 }
 0xc32   :  { %1472 = vst [vmem:[%s2834_s9 + $0x8] sm:$0xff] %v1444_v6 }
 0xcdc   :  { %v1292_v10 = vpop.f32.mrf.mxu1 }
 0xcdd   :  { %v1298_v12 = vadd.f32 %v1292_v10, %v864_v8 }
 0xcde   :  { %v2093_v14 = vpop.f32.mrf.mxu1 }
 0xcdf   :  { %2209 = vtanh.f32 %v1298_v12 }
 0xce0   :  { %v1295_v17 = vpop.f32.mrf.mxu1 }
 0xce2   :  { %v2094_v16 = vpop.f32.mrf.mxu1 }
 0xcec   :  { %v2210_v19 = vpop.eup %2209 }
 0xced   :  { %v1300_v22 = vpack.c.bf16 %v2210_v19, %v2210_v19  ;;  %1533 = vst [vmem:[%s2835_s10 + $0x8] sm:$0xff] %v2210_v19 }
 0xcef   :  { %1301 = vst [vmem:[#allocation3 + $0x1c] sm:$0xf] %v1300_v22 }
 0xcf6   :  { %v2178_v23 = vld [vmem:[#allocation3 + $0x18] sm:$0xff]  }
 0xcf7   :  { %2116 = vmatmul.mubr.bf16.gmra.mxu0 %v2178_v23 }
 0xdb7   :  { %v2117_v18 = vpop.f32.mrf.mxu0 }
 0xdb8   :  { %v1465_v20 = vadd.f32 %v2117_v18, %v1534_v3 }
 0xdb9   :  { %v1456_v24 = vpop.f32.mrf.mxu0 }
 0xdba   :  { %1477 = vst [vmem:[%s2834_s9 + $0x30] sm:$0xff] %v1465_v20  ;;  %v1457_v35 = vadd.f32 %v1534_v3, %v1456_v24 }
 0xdbb   :  { %v2118_v4 = vpop.f32.mrf.mxu0 }
 0xdbc   :  { %1475 = vst [vmem:[%s2834_s9 + $0x20] sm:$0xff] %v1457_v35  ;;  %v1468_v25 = vadd.f32 %v2118_v4, %v1534_v3 }
 0xdbd   :  { %v1459_v26 = vpop.f32.mrf.mxu0 }
 0xdbe   :  { %1478 = vst [vmem:[%s2834_s9 + $0x38] sm:$0xff] %v1468_v25  ;;  %v1460_v27 = vadd.f32 %v1534_v3, %v1459_v26 }
 0xdc0   :  { %1476 = vst [vmem:[%s2834_s9 + $0x28] sm:$0xff] %v1460_v27 }
 0xdc1   :  { %1487 = vsyncpa [#allocation5], 1 }
 0xdc2   :  { %1488 = vsyncpa [#allocation7], 1 }
 0xdc3   :  { %1489 = vsyncpa [#allocation10], 1 }

</bundles_post_ra>
